<compile_context>
chip_gen: v7x
topology: tpu7x:2x2x1
jax: 0.10.0
libtpu: 0.0.40
codegen_flags: <defaults>
</compile_context>

<pallas_src>
import functools

import jax
import jax.numpy as jnp
from jax import lax
from jax.experimental import pallas as pl
from jax.experimental.pallas import tpu as pltpu


def _gate_pad(h):
    """Smallest multiple of 32 that is >= h (so 4 gates tile to a 128-lane multiple)."""
    return max(32, ((h + 31) // 32) * 32)


def _pack_lstm(w_ih, w_hh, b_ih, b_hh, in_pad, gp):
    """PyTorch (4H,Din)/(4H,H)/(4H,) -> transposed, gate-reordered [i,f,o,g], padded.

    Returns:
      wih: (in_pad, 4*gp)  input projection  (rows >= Din are zero)
      whh: (gp,     4*gp)  recurrent proj.   (rows >= H   are zero)
      b:   (1,      4*gp)  b_ih + b_hh       (cols >= H within each gate are zero)
    """
    four_h, din = w_ih.shape
    h = four_h // 4
    perm = jnp.array([0, 1, 3, 2])  # PyTorch [i, f, g, o] -> [i, f, o, g]

    wih = jnp.transpose(w_ih, (1, 0)).reshape(din, 4, h)[:, perm, :].astype(jnp.float32)
    whh = jnp.transpose(w_hh, (1, 0)).reshape(h, 4, h)[:, perm, :].astype(jnp.float32)
    b = (b_ih + b_hh).reshape(4, h)[perm, :].astype(jnp.float32)

    wih_p = jnp.zeros((in_pad, 4, gp), jnp.float32).at[:din, :, :h].set(wih)
    whh_p = jnp.zeros((gp, 4, gp), jnp.float32).at[:h, :, :h].set(whh)
    b_p = jnp.zeros((4, gp), jnp.float32).at[:, :h].set(b)
    return (wih_p.reshape(in_pad, 4 * gp),
            whh_p.reshape(gp, 4 * gp),
            b_p.reshape(1, 4 * gp))


def pack_autoencoder_params(params, estuary_idx):
    """Select one estuary's weights and pre-pack them once, outside the hot path."""
    enc, dec = params["enc"], params["dec"]
    din = enc["w_ih"].shape[-1]        # input_size
    hidden = enc["w_hh"].shape[-1]     # hidden_size
    ge = _gate_pad(hidden)             # encoder gate width (64 for H=64)
    gd = _gate_pad(din)                # decoder gate width (32 for input_size=4)
    packed_enc = _pack_lstm(enc["w_ih"][estuary_idx], enc["w_hh"][estuary_idx],
                            enc["b_ih"][estuary_idx], enc["b_hh"][estuary_idx],
                            in_pad=din, gp=ge)
    packed_dec = _pack_lstm(dec["w_ih"][estuary_idx], dec["w_hh"][estuary_idx],
                            dec["b_ih"][estuary_idx], dec["b_hh"][estuary_idx],
                            in_pad=ge, gp=gd)   # decoder consumes the encoder's h (width ge)
    return packed_enc + packed_dec


def _fused_autoencoder_kernel(T, bp, ge, gd,
                              x_ref, wih_e_ref, whh_e_ref, b_e_ref,
                              wih_d_ref, whh_d_ref, b_d_ref,
                              out_ref, gx_sc):
    """Two chained LSTMs, wavefront-interleaved; nothing intermediate leaves VMEM.

    x_ref:   (T*bp, Din)    time-major, batch-padded, flattened inputs
    wih_e:   (Din, 4*ge)    encoder input projection (gate order [i,f,o,g])
    whh_e:   (ge,  4*ge)    encoder recurrent projection
    b_e:     (1,   4*ge)    encoder b_ih + b_hh
    wih_d:   (ge,  4*gd)    decoder input projection (consumes encoder h)
    whh_d:   (gd,  4*gd)    decoder recurrent projection
    b_d:     (1,   4*gd)    decoder b_ih + b_hh
    out_ref: (T*bp, gd)     decoder hidden states (valid cols = input_size)
    gx_sc:   (T*bp, 4*ge)   hoisted encoder gate projections (all timesteps)
    """
    # ---- hoisted encoder input projection: one MXU op for all T timesteps ----
    gx_sc[...] = jnp.dot(x_ref[...], wih_e_ref[...],
                         preferred_element_type=jnp.float32) + b_e_ref[...]

    whh_e = whh_e_ref[...]                                   # (ge, 4*ge)
    wih_d = wih_d_ref[...]                                   # (ge, 4*gd)
    whh_d = whh_d_ref[...]                                   # (gd, 4*gd)
    b_d = jnp.broadcast_to(b_d_ref[...], (bp, 4 * gd))       # hoisted out of the loop

    def sigmoid(v):
        # Exact identity sigmoid(x) = 0.5*(tanh(x/2)+1): one EUP push per call.
        return 0.5 * jnp.tanh(0.5 * v) + 0.5

    def lstm_combine(gates, c, gp):
        # gates: (bp, 4*gp), order [i, f, o, g] -> one contiguous sigmoid, one tanh.
        sfo = sigmoid(gates[:, :3 * gp])
        g = jnp.tanh(gates[:, 3 * gp:])
        i = sfo[:, 0 * gp:1 * gp]
        f = sfo[:, 1 * gp:2 * gp]
        o = sfo[:, 2 * gp:3 * gp]
        c_new = f * c + i * g
        h_new = o * jnp.tanh(c_new)
        return h_new, c_new

    def enc_step(t, h, c):
        gates = gx_sc[pl.ds(t * bp, bp), :] + jnp.dot(
            h, whh_e, preferred_element_type=jnp.float32)
        return lstm_combine(gates, c, ge)

    def dec_step(x_h, h, c):
        # x_h is the (already available) encoder hidden state; its projection is
        # off the decoder critical path, only h @ whh_d is serial.
        gates = (jnp.dot(x_h, wih_d, preferred_element_type=jnp.float32)
                 + jnp.dot(h, whh_d, preferred_element_type=jnp.float32)
                 + b_d)
        return lstm_combine(gates, c, gd)

    # ---- wavefront: decoder step t-1 overlaps encoder step t ------------------
    h_e, c_e = enc_step(0, jnp.zeros((bp, ge), jnp.float32),
                        jnp.zeros((bp, ge), jnp.float32))
    h_d = jnp.zeros((bp, gd), jnp.float32)
    c_d = jnp.zeros((bp, gd), jnp.float32)

    def body(t, carry):
        h_e, c_e, h_d, c_d = carry
        h_e_prev = h_e
        h_e, c_e = enc_step(t, h_e, c_e)            # encoder step t
        h_d, c_d = dec_step(h_e_prev, h_d, c_d)     # decoder step t-1 (independent)
        out_ref[pl.ds((t - 1) * bp, bp), :] = h_d
        return (h_e, c_e, h_d, c_d)

    h_e, c_e, h_d, c_d = lax.fori_loop(1, T, body, (h_e, c_e, h_d, c_d),
                                       unroll=True)

    # ---- epilogue: final decoder step on the last encoder hidden state --------
    h_d, _ = dec_step(h_e, h_d, c_d)
    out_ref[pl.ds((T - 1) * bp, bp), :] = h_d


@jax.jit
def autoencoder_forward(packed, x):
    """Fused encoder+decoder forward. x: (B, T, input_size), batch_first."""
    wih_e, whh_e, b_e, wih_d, whh_d, b_d = packed
    B, T, din = x.shape
    ge = whh_e.shape[0]                                      # encoder gate width
    gd = whh_d.shape[0]                                      # decoder gate width
    bp = ((B + 7) // 8) * 8                                  # pad batch to f32 sublanes

    x_tb = jnp.transpose(x.astype(jnp.float32), (1, 0, 2))   # (T, B, din) time-major
    x_tb = jnp.pad(x_tb, ((0, 0), (0, bp - B), (0, 0)))      # (T, bp, din)
    x_flat = x_tb.reshape(T * bp, din)

    kernel = functools.partial(_fused_autoencoder_kernel, T, bp, ge, gd)

    out_flat = pl.pallas_call(
        kernel,
        grid=(1,),
        in_specs=[
            pl.BlockSpec((T * bp, din), lambda i: (0, 0)),
            pl.BlockSpec(wih_e.shape, lambda i: (0, 0)),
            pl.BlockSpec(whh_e.shape, lambda i: (0, 0)),
            pl.BlockSpec(b_e.shape, lambda i: (0, 0)),
            pl.BlockSpec(wih_d.shape, lambda i: (0, 0)),
            pl.BlockSpec(whh_d.shape, lambda i: (0, 0)),
            pl.BlockSpec(b_d.shape, lambda i: (0, 0)),
        ],
        out_specs=pl.BlockSpec((T * bp, gd), lambda i: (0, 0)),
        out_shape=jax.ShapeDtypeStruct((T * bp, gd), jnp.float32),
        scratch_shapes=[
            pltpu.VMEM((T * bp, 4 * ge), jnp.float32),   # hoisted encoder gate projections
        ],
        compiler_params=pltpu.CompilerParams(
            dimension_semantics=("arbitrary",)),
    )(x_flat, wih_e, whh_e, b_e, wih_d, whh_d, b_d)

    out = out_flat.reshape(T, bp, gd)[:, :B, :din]           # drop batch/lane padding
    return jnp.transpose(out, (1, 0, 2))                     # back to (B, T, input_size)


def init_autoencoder_params(key, input_size, hidden_size, num_estuaries):
    """Deterministic PyTorch-style LSTM init (uniform +/- 1/sqrt(H)) for all estuaries."""
    def layer(k, din, h):
        k1, k2, k3, k4 = jax.random.split(k, 4)
        s = 1.0 / float(h) ** 0.5
        u = lambda kk, shape: jax.random.uniform(kk, shape, minval=-s, maxval=s,
                                                 dtype=jnp.float32)
        return dict(
            w_ih=u(k1, (num_estuaries, 4 * h, din)),
            w_hh=u(k2, (num_estuaries, 4 * h, h)),
            b_ih=u(k3, (num_estuaries, 4 * h)),
            b_hh=u(k4, (num_estuaries, 4 * h)),
        )

    k_enc, k_dec = jax.random.split(key)
    return dict(
        enc=layer(k_enc, input_size, hidden_size),
        dec=layer(k_dec, hidden_size, input_size),
    )


def _lstm_ref(x_btd, w_ih, w_hh, b_ih, b_hh):
    """Pure-JAX reference of nn.LSTM (batch_first) for validation."""
    B, T, _ = x_btd.shape
    H = w_hh.shape[1]

    def step(carry, x_t):
        h, c = carry
        gates = x_t @ w_ih.T + h @ w_hh.T + b_ih + b_hh
        i, f, g, o = jnp.split(gates, 4, axis=-1)
        c = jax.nn.sigmoid(f) * c + jax.nn.sigmoid(i) * jnp.tanh(g)
        h = jax.nn.sigmoid(o) * jnp.tanh(c)
        return (h, c), h

    h0 = jnp.zeros((B, H), jnp.float32)
    c0 = jnp.zeros((B, H), jnp.float32)
    _, ys = lax.scan(step, (h0, c0), jnp.transpose(x_btd, (1, 0, 2)).astype(jnp.float32))
    return jnp.transpose(ys, (1, 0, 2))


def _autoencoder_ref(params, x, estuary_idx):
    enc, dec = params["enc"], params["dec"]
    h = _lstm_ref(x, enc["w_ih"][estuary_idx], enc["w_hh"][estuary_idx],
                  enc["b_ih"][estuary_idx], enc["b_hh"][estuary_idx])
    return _lstm_ref(h, dec["w_ih"][estuary_idx], dec["w_hh"][estuary_idx],
                     dec["b_ih"][estuary_idx], dec["b_hh"][estuary_idx])


if __name__ == "__main__":
    input_size = 4
    hidden_size = 64
    num_estuaries = 19
    batch = 2
    seq_len = 8
    estuary_idx = 3  # static python int, like the PyTorch ModuleList index

    key = jax.random.PRNGKey(0)
    k_params, k_x = jax.random.split(key)
    params = init_autoencoder_params(k_params, input_size, hidden_size, num_estuaries)
    x = jax.random.normal(k_x, (batch, seq_len, input_size), dtype=jnp.float32)

    # One-time packing (transpose + gate reorder + padding + bias sum) outside the hot path.
    packed = pack_autoencoder_params(params, estuary_idx)
    packed = tuple(jax.block_until_ready(p) for p in packed)

    y = autoencoder_forward(packed, x)
    y = jax.block_until_ready(y)
    assert y.shape == (batch, seq_len, input_size), y.shape

    y_ref = jax.block_until_ready(_autoencoder_ref(params, x, estuary_idx))
    max_err = float(jnp.max(jnp.abs(y - y_ref)))
    assert jnp.allclose(y, y_ref, rtol=1e-4, atol=2e-5), max_err

    print("KERNEL_OK")
</pallas_src>

<mosaic_0001>
module attributes {stable_mosaic.version = 11 : i64} {
  func.func @_fused_autoencoder_kernel(%arg0: i32, %arg1: memref<64x4xf32, #tpu.memory_space<vmem>>, %arg2: memref<4x256xf32, #tpu.memory_space<vmem>>, %arg3: memref<64x256xf32, #tpu.memory_space<vmem>>, %arg4: memref<1x256xf32, #tpu.memory_space<vmem>>, %arg5: memref<64x128xf32, #tpu.memory_space<vmem>>, %arg6: memref<32x128xf32, #tpu.memory_space<vmem>>, %arg7: memref<1x128xf32, #tpu.memory_space<vmem>>, %arg8: memref<64x32xf32, #tpu.memory_space<vmem>>, %arg9: memref<64x256xf32, #tpu.memory_space<vmem>>) attributes {dimension_semantics = [#tpu.dimension_semantics<arbitrary>], iteration_bounds = array<i64: 1>, scalar_prefetch = 0 : i64, scratch_operands = 1 : i64, tpu.core_type = #tpu.core_type<tc>, window_params = [{pipeline_mode = #tpu.pipeline_mode<synchronous>, transform_indices = @transform_0, window_bounds = array<i64: 64, 4>}, {pipeline_mode = #tpu.pipeline_mode<synchronous>, transform_indices = @transform_1, window_bounds = array<i64: 4, 256>}, {pipeline_mode = #tpu.pipeline_mode<synchronous>, transform_indices = @transform_2, window_bounds = array<i64: 64, 256>}, {pipeline_mode = #tpu.pipeline_mode<synchronous>, transform_indices = @transform_3, window_bounds = array<i64: 1, 256>}, {pipeline_mode = #tpu.pipeline_mode<synchronous>, transform_indices = @transform_4, window_bounds = array<i64: 64, 128>}, {pipeline_mode = #tpu.pipeline_mode<synchronous>, transform_indices = @transform_5, window_bounds = array<i64: 32, 128>}, {pipeline_mode = #tpu.pipeline_mode<synchronous>, transform_indices = @transform_6, window_bounds = array<i64: 1, 128>}, {pipeline_mode = #tpu.pipeline_mode<synchronous>, transform_indices = @transform_7, window_bounds = array<i64: 64, 32>}]} {
    %c0 = arith.constant 0 : index
    %c0_0 = arith.constant 0 : index
    %0 = vector.load %arg1[%c0, %c0_0] : memref<64x4xf32, #tpu.memory_space<vmem>>, vector<64x4xf32>
    %c0_1 = arith.constant 0 : index
    %c0_2 = arith.constant 0 : index
    %1 = vector.load %arg2[%c0_1, %c0_2] : memref<4x256xf32, #tpu.memory_space<vmem>>, vector<4x256xf32>
    %cst = arith.constant dense<0.000000e+00> : vector<64x256xf32>
    %2 = tpu.matmul %0, %1, %cst {dimension_numbers = #tpu.dot_dimension_numbers<[1], [0], [0], [1], [0, 0, 1, 1], [], []>} : vector<64x4xf32>, vector<4x256xf32>, vector<64x256xf32> -> vector<64x256xf32>
    %c0_3 = arith.constant 0 : index
    %c0_4 = arith.constant 0 : index
    %3 = vector.load %arg4[%c0_3, %c0_4] : memref<1x256xf32, #tpu.memory_space<vmem>>, vector<1x256xf32>
    %4 = vector.broadcast %3 : vector<1x256xf32> to vector<64x256xf32>
    %5 = arith.addf %2, %4 : vector<64x256xf32>
    %c0_5 = arith.constant 0 : index
    %c0_6 = arith.constant 0 : index
    %6 = vector.load %arg9[%c0_5, %c0_6] : memref<64x256xf32, #tpu.memory_space<vmem>>, vector<64x256xf32>
    tpu.vector_store %arg9[%c0_5, %c0_6], %5 {strides = array<i32>} : memref<64x256xf32, #tpu.memory_space<vmem>>, vector<64x256xf32>,
    %c0_7 = arith.constant 0 : index
    %c0_8 = arith.constant 0 : index
    %7 = vector.load %arg3[%c0_7, %c0_8] : memref<64x256xf32, #tpu.memory_space<vmem>>, vector<64x256xf32>
    %c0_9 = arith.constant 0 : index
    %c0_10 = arith.constant 0 : index
    %8 = vector.load %arg5[%c0_9, %c0_10] : memref<64x128xf32, #tpu.memory_space<vmem>>, vector<64x128xf32>
    %c0_11 = arith.constant 0 : index
    %c0_12 = arith.constant 0 : index
    %9 = vector.load %arg6[%c0_11, %c0_12] : memref<32x128xf32, #tpu.memory_space<vmem>>, vector<32x128xf32>
    %c0_13 = arith.constant 0 : index
    %c0_14 = arith.constant 0 : index
    %10 = vector.load %arg7[%c0_13, %c0_14] : memref<1x128xf32, #tpu.memory_space<vmem>>, vector<1x128xf32>
    %11 = vector.shape_cast %10 : vector<1x128xf32> to vector<1x128xf32>
    %12 = vector.broadcast %11 : vector<1x128xf32> to vector<8x128xf32>
    %cst_15 = arith.constant 0.000000e+00 : f32
    %13 = vector.broadcast %cst_15 : f32 to vector<8x64xf32>
    %cst_16 = arith.constant 0.000000e+00 : f32
    %14 = vector.broadcast %cst_16 : f32 to vector<8x64xf32>
    %c0_17 = arith.constant 0 : index
    %c0_18 = arith.constant 0 : index
    %15 = vector.load %arg9[%c0_17, %c0_18] : memref<64x256xf32, #tpu.memory_space<vmem>>, vector<8x256xf32>
    %cst_19 = arith.constant dense<0.000000e+00> : vector<8x256xf32>
    %16 = tpu.matmul %13, %7, %cst_19 {dimension_numbers = #tpu.dot_dimension_numbers<[1], [0], [0], [1], [0, 0, 1, 1], [], []>} : vector<8x64xf32>, vector<64x256xf32>, vector<8x256xf32> -> vector<8x256xf32>
    %17 = arith.addf %15, %16 : vector<8x256xf32>
    %18 = vector.extract_strided_slice %17 {offsets = [0, 0], sizes = [8, 192], strides = [1, 1]} : vector<8x256xf32> to vector<8x192xf32>
    %cst_20 = arith.constant 5.000000e-01 : f32
    %19 = vector.broadcast %cst_20 : f32 to vector<8x192xf32>
    %20 = arith.mulf %19, %18 : vector<8x192xf32>
    %21 = math.tanh %20 : vector<8x192xf32>
    %cst_21 = arith.constant 5.000000e-01 : f32
    %22 = vector.broadcast %cst_21 : f32 to vector<8x192xf32>
    %23 = arith.mulf %22, %21 : vector<8x192xf32>
    %cst_22 = arith.constant 5.000000e-01 : f32
    %24 = vector.broadcast %cst_22 : f32 to vector<8x192xf32>
    %25 = arith.addf %23, %24 : vector<8x192xf32>
    %26 = vector.extract_strided_slice %17 {offsets = [0, 192], sizes = [8, 64], strides = [1, 1]} : vector<8x256xf32> to vector<8x64xf32>
    %27 = math.tanh %26 : vector<8x64xf32>
    %28 = vector.extract_strided_slice %25 {offsets = [0, 0], sizes = [8, 64], strides = [1, 1]} : vector<8x192xf32> to vector<8x64xf32>
    %29 = vector.extract_strided_slice %25 {offsets = [0, 64], sizes = [8, 64], strides = [1, 1]} : vector<8x192xf32> to vector<8x64xf32>
    %30 = vector.extract_strided_slice %25 {offsets = [0, 128], sizes = [8, 64], strides = [1, 1]} : vector<8x192xf32> to vector<8x64xf32>
    %31 = arith.mulf %29, %14 : vector<8x64xf32>
    %32 = arith.mulf %28, %27 : vector<8x64xf32>
    %33 = arith.addf %31, %32 : vector<8x64xf32>
    %34 = math.tanh %33 : vector<8x64xf32>
    %35 = arith.mulf %30, %34 : vector<8x64xf32>
    %cst_23 = arith.constant 0.000000e+00 : f32
    %36 = vector.broadcast %cst_23 : f32 to vector<8x32xf32>
    %cst_24 = arith.constant 0.000000e+00 : f32
    %37 = vector.broadcast %cst_24 : f32 to vector<8x32xf32>
    %c1_i32 = arith.constant 1 : i32
    %c8_i32 = arith.constant 8 : i32
    %38 = arith.muli %c1_i32, %c8_i32 : i32
    %39 = arith.index_cast %38 : i32 to index
    %c0_25 = arith.constant 0 : index
    %40 = vector.load %arg9[%39, %c0_25] : memref<64x256xf32, #tpu.memory_space<vmem>>, vector<8x256xf32>
    %cst_26 = arith.constant dense<0.000000e+00> : vector<8x256xf32>
    %41 = tpu.matmul %35, %7, %cst_26 {dimension_numbers = #tpu.dot_dimension_numbers<[1], [0], [0], [1], [0, 0, 1, 1], [], []>} : vector<8x64xf32>, vector<64x256xf32>, vector<8x256xf32> -> vector<8x256xf32>
    %42 = arith.addf %40, %41 : vector<8x256xf32>
    %43 = vector.extract_strided_slice %42 {offsets = [0, 0], sizes = [8, 192], strides = [1, 1]} : vector<8x256xf32> to vector<8x192xf32>
    %cst_27 = arith.constant 5.000000e-01 : f32
    %44 = vector.broadcast %cst_27 : f32 to vector<8x192xf32>
    %45 = arith.mulf %44, %43 : vector<8x192xf32>
    %46 = math.tanh %45 : vector<8x192xf32>
    %cst_28 = arith.constant 5.000000e-01 : f32
    %47 = vector.broadcast %cst_28 : f32 to vector<8x192xf32>
    %48 = arith.mulf %47, %46 : vector<8x192xf32>
    %cst_29 = arith.constant 5.000000e-01 : f32
    %49 = vector.broadcast %cst_29 : f32 to vector<8x192xf32>
    %50 = arith.addf %48, %49 : vector<8x192xf32>
    %51 = vector.extract_strided_slice %42 {offsets = [0, 192], sizes = [8, 64], strides = [1, 1]} : vector<8x256xf32> to vector<8x64xf32>
    %52 = math.tanh %51 : vector<8x64xf32>
    %53 = vector.extract_strided_slice %50 {offsets = [0, 0], sizes = [8, 64], strides = [1, 1]} : vector<8x192xf32> to vector<8x64xf32>
    %54 = vector.extract_strided_slice %50 {offsets = [0, 64], sizes = [8, 64], strides = [1, 1]} : vector<8x192xf32> to vector<8x64xf32>
    %55 = vector.extract_strided_slice %50 {offsets = [0, 128], sizes = [8, 64], strides = [1, 1]} : vector<8x192xf32> to vector<8x64xf32>
    %56 = arith.mulf %54, %33 : vector<8x64xf32>
    %57 = arith.mulf %53, %52 : vector<8x64xf32>
    %58 = arith.addf %56, %57 : vector<8x64xf32>
    %59 = math.tanh %58 : vector<8x64xf32>
    %60 = arith.mulf %55, %59 : vector<8x64xf32>
    %cst_30 = arith.constant dense<0.000000e+00> : vector<8x128xf32>
    %61 = tpu.matmul %35, %8, %cst_30 {dimension_numbers = #tpu.dot_dimension_numbers<[1], [0], [0], [1], [0, 0, 1, 1], [], []>} : vector<8x64xf32>, vector<64x128xf32>, vector<8x128xf32> -> vector<8x128xf32>
    %cst_31 = arith.constant dense<0.000000e+00> : vector<8x128xf32>
    %62 = tpu.matmul %36, %9, %cst_31 {dimension_numbers = #tpu.dot_dimension_numbers<[1], [0], [0], [1], [0, 0, 1, 1], [], []>} : vector<8x32xf32>, vector<32x128xf32>, vector<8x128xf32> -> vector<8x128xf32>
    %63 = arith.addf %61, %62 : vector<8x128xf32>
    %64 = arith.addf %63, %12 : vector<8x128xf32>
    %65 = vector.extract_strided_slice %64 {offsets = [0, 0], sizes = [8, 96], strides = [1, 1]} : vector<8x128xf32> to vector<8x96xf32>
    %cst_32 = arith.constant 5.000000e-01 : f32
    %66 = vector.broadcast %cst_32 : f32 to vector<8x96xf32>
    %67 = arith.mulf %66, %65 : vector<8x96xf32>
    %68 = math.tanh %67 : vector<8x96xf32>
    %cst_33 = arith.constant 5.000000e-01 : f32
    %69 = vector.broadcast %cst_33 : f32 to vector<8x96xf32>
    %70 = arith.mulf %69, %68 : vector<8x96xf32>
    %cst_34 = arith.constant 5.000000e-01 : f32
    %71 = vector.broadcast %cst_34 : f32 to vector<8x96xf32>
    %72 = arith.addf %70, %71 : vector<8x96xf32>
    %73 = vector.extract_strided_slice %64 {offsets = [0, 96], sizes = [8, 32], strides = [1, 1]} : vector<8x128xf32> to vector<8x32xf32>
    %74 = math.tanh %73 : vector<8x32xf32>
    %75 = vector.extract_strided_slice %72 {offsets = [0, 0], sizes = [8, 32], strides = [1, 1]} : vector<8x96xf32> to vector<8x32xf32>
    %76 = vector.extract_strided_slice %72 {offsets = [0, 32], sizes = [8, 32], strides = [1, 1]} : vector<8x96xf32> to vector<8x32xf32>
    %77 = vector.extract_strided_slice %72 {offsets = [0, 64], sizes = [8, 32], strides = [1, 1]} : vector<8x96xf32> to vector<8x32xf32>
    %78 = arith.mulf %76, %37 : vector<8x32xf32>
    %79 = arith.mulf %75, %74 : vector<8x32xf32>
    %80 = arith.addf %78, %79 : vector<8x32xf32>
    %81 = math.tanh %80 : vector<8x32xf32>
    %82 = arith.mulf %77, %81 : vector<8x32xf32>
    %c1_i32_35 = arith.constant 1 : i32
    %83 = arith.subi %c1_i32, %c1_i32_35 : i32
    %c8_i32_36 = arith.constant 8 : i32
    %84 = arith.muli %83, %c8_i32_36 : i32
    %85 = arith.index_cast %84 : i32 to index
    %c0_37 = arith.constant 0 : index
    %86 = vector.load %arg8[%85, %c0_37] : memref<64x32xf32, #tpu.memory_space<vmem>>, vector<8x32xf32>
    tpu.vector_store %arg8[%85, %c0_37], %82 {strides = array<i32>} : memref<64x32xf32, #tpu.memory_space<vmem>>, vector<8x32xf32>,
    %c2_i32 = arith.constant 2 : i32
    %c8_i32_38 = arith.constant 8 : i32
    %87 = arith.muli %c2_i32, %c8_i32_38 : i32
    %88 = arith.index_cast %87 : i32 to index
    %c0_39 = arith.constant 0 : index
    %89 = vector.load %arg9[%88, %c0_39] : memref<64x256xf32, #tpu.memory_space<vmem>>, vector<8x256xf32>
    %cst_40 = arith.constant dense<0.000000e+00> : vector<8x256xf32>
    %90 = tpu.matmul %60, %7, %cst_40 {dimension_numbers = #tpu.dot_dimension_numbers<[1], [0], [0], [1], [0, 0, 1, 1], [], []>} : vector<8x64xf32>, vector<64x256xf32>, vector<8x256xf32> -> vector<8x256xf32>
    %91 = arith.addf %89, %90 : vector<8x256xf32>
    %92 = vector.extract_strided_slice %91 {offsets = [0, 0], sizes = [8, 192], strides = [1, 1]} : vector<8x256xf32> to vector<8x192xf32>
    %cst_41 = arith.constant 5.000000e-01 : f32
    %93 = vector.broadcast %cst_41 : f32 to vector<8x192xf32>
    %94 = arith.mulf %93, %92 : vector<8x192xf32>
    %95 = math.tanh %94 : vector<8x192xf32>
    %cst_42 = arith.constant 5.000000e-01 : f32
    %96 = vector.broadcast %cst_42 : f32 to vector<8x192xf32>
    %97 = arith.mulf %96, %95 : vector<8x192xf32>
    %cst_43 = arith.constant 5.000000e-01 : f32
    %98 = vector.broadcast %cst_43 : f32 to vector<8x192xf32>
    %99 = arith.addf %97, %98 : vector<8x192xf32>
    %100 = vector.extract_strided_slice %91 {offsets = [0, 192], sizes = [8, 64], strides = [1, 1]} : vector<8x256xf32> to vector<8x64xf32>
    %101 = math.tanh %100 : vector<8x64xf32>
    %102 = vector.extract_strided_slice %99 {offsets = [0, 0], sizes = [8, 64], strides = [1, 1]} : vector<8x192xf32> to vector<8x64xf32>
    %103 = vector.extract_strided_slice %99 {offsets = [0, 64], sizes = [8, 64], strides = [1, 1]} : vector<8x192xf32> to vector<8x64xf32>
    %104 = vector.extract_strided_slice %99 {offsets = [0, 128], sizes = [8, 64], strides = [1, 1]} : vector<8x192xf32> to vector<8x64xf32>
    %105 = arith.mulf %103, %58 : vector<8x64xf32>
    %106 = arith.mulf %102, %101 : vector<8x64xf32>
    %107 = arith.addf %105, %106 : vector<8x64xf32>
    %108 = math.tanh %107 : vector<8x64xf32>
    %109 = arith.mulf %104, %108 : vector<8x64xf32>
    %cst_44 = arith.constant dense<0.000000e+00> : vector<8x128xf32>
    %110 = tpu.matmul %60, %8, %cst_44 {dimension_numbers = #tpu.dot_dimension_numbers<[1], [0], [0], [1], [0, 0, 1, 1], [], []>} : vector<8x64xf32>, vector<64x128xf32>, vector<8x128xf32> -> vector<8x128xf32>
    %cst_45 = arith.constant dense<0.000000e+00> : vector<8x128xf32>
    %111 = tpu.matmul %82, %9, %cst_45 {dimension_numbers = #tpu.dot_dimension_numbers<[1], [0], [0], [1], [0, 0, 1, 1], [], []>} : vector<8x32xf32>, vector<32x128xf32>, vector<8x128xf32> -> vector<8x128xf32>
    %112 = arith.addf %110, %111 : vector<8x128xf32>
    %113 = arith.addf %112, %12 : vector<8x128xf32>
    %114 = vector.extract_strided_slice %113 {offsets = [0, 0], sizes = [8, 96], strides = [1, 1]} : vector<8x128xf32> to vector<8x96xf32>
    %cst_46 = arith.constant 5.000000e-01 : f32
    %115 = vector.broadcast %cst_46 : f32 to vector<8x96xf32>
    %116 = arith.mulf %115, %114 : vector<8x96xf32>
    %117 = math.tanh %116 : vector<8x96xf32>
    %cst_47 = arith.constant 5.000000e-01 : f32
    %118 = vector.broadcast %cst_47 : f32 to vector<8x96xf32>
    %119 = arith.mulf %118, %117 : vector<8x96xf32>
    %cst_48 = arith.constant 5.000000e-01 : f32
    %120 = vector.broadcast %cst_48 : f32 to vector<8x96xf32>
    %121 = arith.addf %119, %120 : vector<8x96xf32>
    %122 = vector.extract_strided_slice %113 {offsets = [0, 96], sizes = [8, 32], strides = [1, 1]} : vector<8x128xf32> to vector<8x32xf32>
    %123 = math.tanh %122 : vector<8x32xf32>
    %124 = vector.extract_strided_slice %121 {offsets = [0, 0], sizes = [8, 32], strides = [1, 1]} : vector<8x96xf32> to vector<8x32xf32>
    %125 = vector.extract_strided_slice %121 {offsets = [0, 32], sizes = [8, 32], strides = [1, 1]} : vector<8x96xf32> to vector<8x32xf32>
    %126 = vector.extract_strided_slice %121 {offsets = [0, 64], sizes = [8, 32], strides = [1, 1]} : vector<8x96xf32> to vector<8x32xf32>
    %127 = arith.mulf %125, %80 : vector<8x32xf32>
    %128 = arith.mulf %124, %123 : vector<8x32xf32>
    %129 = arith.addf %127, %128 : vector<8x32xf32>
    %130 = math.tanh %129 : vector<8x32xf32>
    %131 = arith.mulf %126, %130 : vector<8x32xf32>
    %c1_i32_49 = arith.constant 1 : i32
    %132 = arith.subi %c2_i32, %c1_i32_49 : i32
    %c8_i32_50 = arith.constant 8 : i32
    %133 = arith.muli %132, %c8_i32_50 : i32
    %134 = arith.index_cast %133 : i32 to index
    %c0_51 = arith.constant 0 : index
    %135 = vector.load %arg8[%134, %c0_51] : memref<64x32xf32, #tpu.memory_space<vmem>>, vector<8x32xf32>
    tpu.vector_store %arg8[%134, %c0_51], %131 {strides = array<i32>} : memref<64x32xf32, #tpu.memory_space<vmem>>, vector<8x32xf32>,
    %c3_i32 = arith.constant 3 : i32
    %c8_i32_52 = arith.constant 8 : i32
    %136 = arith.muli %c3_i32, %c8_i32_52 : i32
    %137 = arith.index_cast %136 : i32 to index
    %c0_53 = arith.constant 0 : index
    %138 = vector.load %arg9[%137, %c0_53] : memref<64x256xf32, #tpu.memory_space<vmem>>, vector<8x256xf32>
    %cst_54 = arith.constant dense<0.000000e+00> : vector<8x256xf32>
    %139 = tpu.matmul %109, %7, %cst_54 {dimension_numbers = #tpu.dot_dimension_numbers<[1], [0], [0], [1], [0, 0, 1, 1], [], []>} : vector<8x64xf32>, vector<64x256xf32>, vector<8x256xf32> -> vector<8x256xf32>
    %140 = arith.addf %138, %139 : vector<8x256xf32>
    %141 = vector.extract_strided_slice %140 {offsets = [0, 0], sizes = [8, 192], strides = [1, 1]} : vector<8x256xf32> to vector<8x192xf32>
    %cst_55 = arith.constant 5.000000e-01 : f32
    %142 = vector.broadcast %cst_55 : f32 to vector<8x192xf32>
    %143 = arith.mulf %142, %141 : vector<8x192xf32>
    %144 = math.tanh %143 : vector<8x192xf32>
    %cst_56 = arith.constant 5.000000e-01 : f32
    %145 = vector.broadcast %cst_56 : f32 to vector<8x192xf32>
    %146 = arith.mulf %145, %144 : vector<8x192xf32>
    %cst_57 = arith.constant 5.000000e-01 : f32
    %147 = vector.broadcast %cst_57 : f32 to vector<8x192xf32>
    %148 = arith.addf %146, %147 : vector<8x192xf32>
    %149 = vector.extract_strided_slice %140 {offsets = [0, 192], sizes = [8, 64], strides = [1, 1]} : vector<8x256xf32> to vector<8x64xf32>
    %150 = math.tanh %149 : vector<8x64xf32>
    %151 = vector.extract_strided_slice %148 {offsets = [0, 0], sizes = [8, 64], strides = [1, 1]} : vector<8x192xf32> to vector<8x64xf32>
    %152 = vector.extract_strided_slice %148 {offsets = [0, 64], sizes = [8, 64], strides = [1, 1]} : vector<8x192xf32> to vector<8x64xf32>
    %153 = vector.extract_strided_slice %148 {offsets = [0, 128], sizes = [8, 64], strides = [1, 1]} : vector<8x192xf32> to vector<8x64xf32>
    %154 = arith.mulf %152, %107 : vector<8x64xf32>
    %155 = arith.mulf %151, %150 : vector<8x64xf32>
    %156 = arith.addf %154, %155 : vector<8x64xf32>
    %157 = math.tanh %156 : vector<8x64xf32>
    %158 = arith.mulf %153, %157 : vector<8x64xf32>
    %cst_58 = arith.constant dense<0.000000e+00> : vector<8x128xf32>
    %159 = tpu.matmul %109, %8, %cst_58 {dimension_numbers = #tpu.dot_dimension_numbers<[1], [0], [0], [1], [0, 0, 1, 1], [], []>} : vector<8x64xf32>, vector<64x128xf32>, vector<8x128xf32> -> vector<8x128xf32>
    %cst_59 = arith.constant dense<0.000000e+00> : vector<8x128xf32>
    %160 = tpu.matmul %131, %9, %cst_59 {dimension_numbers = #tpu.dot_dimension_numbers<[1], [0], [0], [1], [0, 0, 1, 1], [], []>} : vector<8x32xf32>, vector<32x128xf32>, vector<8x128xf32> -> vector<8x128xf32>
    %161 = arith.addf %159, %160 : vector<8x128xf32>
    %162 = arith.addf %161, %12 : vector<8x128xf32>
    %163 = vector.extract_strided_slice %162 {offsets = [0, 0], sizes = [8, 96], strides = [1, 1]} : vector<8x128xf32> to vector<8x96xf32>
    %cst_60 = arith.constant 5.000000e-01 : f32
    %164 = vector.broadcast %cst_60 : f32 to vector<8x96xf32>
    %165 = arith.mulf %164, %163 : vector<8x96xf32>
    %166 = math.tanh %165 : vector<8x96xf32>
    %cst_61 = arith.constant 5.000000e-01 : f32
    %167 = vector.broadcast %cst_61 : f32 to vector<8x96xf32>
    %168 = arith.mulf %167, %166 : vector<8x96xf32>
    %cst_62 = arith.constant 5.000000e-01 : f32
    %169 = vector.broadcast %cst_62 : f32 to vector<8x96xf32>
    %170 = arith.addf %168, %169 : vector<8x96xf32>
    %171 = vector.extract_strided_slice %162 {offsets = [0, 96], sizes = [8, 32], strides = [1, 1]} : vector<8x128xf32> to vector<8x32xf32>
    %172 = math.tanh %171 : vector<8x32xf32>
    %173 = vector.extract_strided_slice %170 {offsets = [0, 0], sizes = [8, 32], strides = [1, 1]} : vector<8x96xf32> to vector<8x32xf32>
    %174 = vector.extract_strided_slice %170 {offsets = [0, 32], sizes = [8, 32], strides = [1, 1]} : vector<8x96xf32> to vector<8x32xf32>
    %175 = vector.extract_strided_slice %170 {offsets = [0, 64], sizes = [8, 32], strides = [1, 1]} : vector<8x96xf32> to vector<8x32xf32>
    %176 = arith.mulf %174, %129 : vector<8x32xf32>
    %177 = arith.mulf %173, %172 : vector<8x32xf32>
    %178 = arith.addf %176, %177 : vector<8x32xf32>
    %179 = math.tanh %178 : vector<8x32xf32>
    %180 = arith.mulf %175, %179 : vector<8x32xf32>
    %c1_i32_63 = arith.constant 1 : i32
    %181 = arith.subi %c3_i32, %c1_i32_63 : i32
    %c8_i32_64 = arith.constant 8 : i32
    %182 = arith.muli %181, %c8_i32_64 : i32
    %183 = arith.index_cast %182 : i32 to index
    %c0_65 = arith.constant 0 : index
    %184 = vector.load %arg8[%183, %c0_65] : memref<64x32xf32, #tpu.memory_space<vmem>>, vector<8x32xf32>
    tpu.vector_store %arg8[%183, %c0_65], %180 {strides = array<i32>} : memref<64x32xf32, #tpu.memory_space<vmem>>, vector<8x32xf32>,
    %c4_i32 = arith.constant 4 : i32
    %c8_i32_66 = arith.constant 8 : i32
    %185 = arith.muli %c4_i32, %c8_i32_66 : i32
    %186 = arith.index_cast %185 : i32 to index
    %c0_67 = arith.constant 0 : index
    %187 = vector.load %arg9[%186, %c0_67] : memref<64x256xf32, #tpu.memory_space<vmem>>, vector<8x256xf32>
    %cst_68 = arith.constant dense<0.000000e+00> : vector<8x256xf32>
    %188 = tpu.matmul %158, %7, %cst_68 {dimension_numbers = #tpu.dot_dimension_numbers<[1], [0], [0], [1], [0, 0, 1, 1], [], []>} : vector<8x64xf32>, vector<64x256xf32>, vector<8x256xf32> -> vector<8x256xf32>
    %189 = arith.addf %187, %188 : vector<8x256xf32>
    %190 = vector.extract_strided_slice %189 {offsets = [0, 0], sizes = [8, 192], strides = [1, 1]} : vector<8x256xf32> to vector<8x192xf32>
    %cst_69 = arith.constant 5.000000e-01 : f32
    %191 = vector.broadcast %cst_69 : f32 to vector<8x192xf32>
    %192 = arith.mulf %191, %190 : vector<8x192xf32>
    %193 = math.tanh %192 : vector<8x192xf32>
    %cst_70 = arith.constant 5.000000e-01 : f32
    %194 = vector.broadcast %cst_70 : f32 to vector<8x192xf32>
    %195 = arith.mulf %194, %193 : vector<8x192xf32>
    %cst_71 = arith.constant 5.000000e-01 : f32
    %196 = vector.broadcast %cst_71 : f32 to vector<8x192xf32>
    %197 = arith.addf %195, %196 : vector<8x192xf32>
    %198 = vector.extract_strided_slice %189 {offsets = [0, 192], sizes = [8, 64], strides = [1, 1]} : vector<8x256xf32> to vector<8x64xf32>
    %199 = math.tanh %198 : vector<8x64xf32>
    %200 = vector.extract_strided_slice %197 {offsets = [0, 0], sizes = [8, 64], strides = [1, 1]} : vector<8x192xf32> to vector<8x64xf32>
    %201 = vector.extract_strided_slice %197 {offsets = [0, 64], sizes = [8, 64], strides = [1, 1]} : vector<8x192xf32> to vector<8x64xf32>
    %202 = vector.extract_strided_slice %197 {offsets = [0, 128], sizes = [8, 64], strides = [1, 1]} : vector<8x192xf32> to vector<8x64xf32>
    %203 = arith.mulf %201, %156 : vector<8x64xf32>
    %204 = arith.mulf %200, %199 : vector<8x64xf32>
    %205 = arith.addf %203, %204 : vector<8x64xf32>
    %206 = math.tanh %205 : vector<8x64xf32>
    %207 = arith.mulf %202, %206 : vector<8x64xf32>
    %cst_72 = arith.constant dense<0.000000e+00> : vector<8x128xf32>
    %208 = tpu.matmul %158, %8, %cst_72 {dimension_numbers = #tpu.dot_dimension_numbers<[1], [0], [0], [1], [0, 0, 1, 1], [], []>} : vector<8x64xf32>, vector<64x128xf32>, vector<8x128xf32> -> vector<8x128xf32>
    %cst_73 = arith.constant dense<0.000000e+00> : vector<8x128xf32>
    %209 = tpu.matmul %180, %9, %cst_73 {dimension_numbers = #tpu.dot_dimension_numbers<[1], [0], [0], [1], [0, 0, 1, 1], [], []>} : vector<8x32xf32>, vector<32x128xf32>, vector<8x128xf32> -> vector<8x128xf32>
    %210 = arith.addf %208, %209 : vector<8x128xf32>
    %211 = arith.addf %210, %12 : vector<8x128xf32>
    %212 = vector.extract_strided_slice %211 {offsets = [0, 0], sizes = [8, 96], strides = [1, 1]} : vector<8x128xf32> to vector<8x96xf32>
    %cst_74 = arith.constant 5.000000e-01 : f32
    %213 = vector.broadcast %cst_74 : f32 to vector<8x96xf32>
    %214 = arith.mulf %213, %212 : vector<8x96xf32>
    %215 = math.tanh %214 : vector<8x96xf32>
    %cst_75 = arith.constant 5.000000e-01 : f32
    %216 = vector.broadcast %cst_75 : f32 to vector<8x96xf32>
    %217 = arith.mulf %216, %215 : vector<8x96xf32>
    %cst_76 = arith.constant 5.000000e-01 : f32
    %218 = vector.broadcast %cst_76 : f32 to vector<8x96xf32>
    %219 = arith.addf %217, %218 : vector<8x96xf32>
    %220 = vector.extract_strided_slice %211 {offsets = [0, 96], sizes = [8, 32], strides = [1, 1]} : vector<8x128xf32> to vector<8x32xf32>
    %221 = math.tanh %220 : vector<8x32xf32>
    %222 = vector.extract_strided_slice %219 {offsets = [0, 0], sizes = [8, 32], strides = [1, 1]} : vector<8x96xf32> to vector<8x32xf32>
    %223 = vector.extract_strided_slice %219 {offsets = [0, 32], sizes = [8, 32], strides = [1, 1]} : vector<8x96xf32> to vector<8x32xf32>
    %224 = vector.extract_strided_slice %219 {offsets = [0, 64], sizes = [8, 32], strides = [1, 1]} : vector<8x96xf32> to vector<8x32xf32>
    %225 = arith.mulf %223, %178 : vector<8x32xf32>
    %226 = arith.mulf %222, %221 : vector<8x32xf32>
    %227 = arith.addf %225, %226 : vector<8x32xf32>
    %228 = math.tanh %227 : vector<8x32xf32>
    %229 = arith.mulf %224, %228 : vector<8x32xf32>
    %c1_i32_77 = arith.constant 1 : i32
    %230 = arith.subi %c4_i32, %c1_i32_77 : i32
    %c8_i32_78 = arith.constant 8 : i32
    %231 = arith.muli %230, %c8_i32_78 : i32
    %232 = arith.index_cast %231 : i32 to index
    %c0_79 = arith.constant 0 : index
    %233 = vector.load %arg8[%232, %c0_79] : memref<64x32xf32, #tpu.memory_space<vmem>>, vector<8x32xf32>
    tpu.vector_store %arg8[%232, %c0_79], %229 {strides = array<i32>} : memref<64x32xf32, #tpu.memory_space<vmem>>, vector<8x32xf32>,
    %c5_i32 = arith.constant 5 : i32
    %c8_i32_80 = arith.constant 8 : i32
    %234 = arith.muli %c5_i32, %c8_i32_80 : i32
    %235 = arith.index_cast %234 : i32 to index
    %c0_81 = arith.constant 0 : index
    %236 = vector.load %arg9[%235, %c0_81] : memref<64x256xf32, #tpu.memory_space<vmem>>, vector<8x256xf32>
    %cst_82 = arith.constant dense<0.000000e+00> : vector<8x256xf32>
    %237 = tpu.matmul %207, %7, %cst_82 {dimension_numbers = #tpu.dot_dimension_numbers<[1], [0], [0], [1], [0, 0, 1, 1], [], []>} : vector<8x64xf32>, vector<64x256xf32>, vector<8x256xf32> -> vector<8x256xf32>
    %238 = arith.addf %236, %237 : vector<8x256xf32>
    %239 = vector.extract_strided_slice %238 {offsets = [0, 0], sizes = [8, 192], strides = [1, 1]} : vector<8x256xf32> to vector<8x192xf32>
    %cst_83 = arith.constant 5.000000e-01 : f32
    %240 = vector.broadcast %cst_83 : f32 to vector<8x192xf32>
    %241 = arith.mulf %240, %239 : vector<8x192xf32>
    %242 = math.tanh %241 : vector<8x192xf32>
    %cst_84 = arith.constant 5.000000e-01 : f32
    %243 = vector.broadcast %cst_84 : f32 to vector<8x192xf32>
    %244 = arith.mulf %243, %242 : vector<8x192xf32>
    %cst_85 = arith.constant 5.000000e-01 : f32
    %245 = vector.broadcast %cst_85 : f32 to vector<8x192xf32>
    %246 = arith.addf %244, %245 : vector<8x192xf32>
    %247 = vector.extract_strided_slice %238 {offsets = [0, 192], sizes = [8, 64], strides = [1, 1]} : vector<8x256xf32> to vector<8x64xf32>
    %248 = math.tanh %247 : vector<8x64xf32>
    %249 = vector.extract_strided_slice %246 {offsets = [0, 0], sizes = [8, 64], strides = [1, 1]} : vector<8x192xf32> to vector<8x64xf32>
    %250 = vector.extract_strided_slice %246 {offsets = [0, 64], sizes = [8, 64], strides = [1, 1]} : vector<8x192xf32> to vector<8x64xf32>
    %251 = vector.extract_strided_slice %246 {offsets = [0, 128], sizes = [8, 64], strides = [1, 1]} : vector<8x192xf32> to vector<8x64xf32>
    %252 = arith.mulf %250, %205 : vector<8x64xf32>
    %253 = arith.mulf %249, %248 : vector<8x64xf32>
    %254 = arith.addf %252, %253 : vector<8x64xf32>
    %255 = math.tanh %254 : vector<8x64xf32>
    %256 = arith.mulf %251, %255 : vector<8x64xf32>
    %cst_86 = arith.constant dense<0.000000e+00> : vector<8x128xf32>
    %257 = tpu.matmul %207, %8, %cst_86 {dimension_numbers = #tpu.dot_dimension_numbers<[1], [0], [0], [1], [0, 0, 1, 1], [], []>} : vector<8x64xf32>, vector<64x128xf32>, vector<8x128xf32> -> vector<8x128xf32>
    %cst_87 = arith.constant dense<0.000000e+00> : vector<8x128xf32>
    %258 = tpu.matmul %229, %9, %cst_87 {dimension_numbers = #tpu.dot_dimension_numbers<[1], [0], [0], [1], [0, 0, 1, 1], [], []>} : vector<8x32xf32>, vector<32x128xf32>, vector<8x128xf32> -> vector<8x128xf32>
    %259 = arith.addf %257, %258 : vector<8x128xf32>
    %260 = arith.addf %259, %12 : vector<8x128xf32>
    %261 = vector.extract_strided_slice %260 {offsets = [0, 0], sizes = [8, 96], strides = [1, 1]} : vector<8x128xf32> to vector<8x96xf32>
    %cst_88 = arith.constant 5.000000e-01 : f32
    %262 = vector.broadcast %cst_88 : f32 to vector<8x96xf32>
    %263 = arith.mulf %262, %261 : vector<8x96xf32>
    %264 = math.tanh %263 : vector<8x96xf32>
    %cst_89 = arith.constant 5.000000e-01 : f32
    %265 = vector.broadcast %cst_89 : f32 to vector<8x96xf32>
    %266 = arith.mulf %265, %264 : vector<8x96xf32>
    %cst_90 = arith.constant 5.000000e-01 : f32
    %267 = vector.broadcast %cst_90 : f32 to vector<8x96xf32>
    %268 = arith.addf %266, %267 : vector<8x96xf32>
    %269 = vector.extract_strided_slice %260 {offsets = [0, 96], sizes = [8, 32], strides = [1, 1]} : vector<8x128xf32> to vector<8x32xf32>
    %270 = math.tanh %269 : vector<8x32xf32>
    %271 = vector.extract_strided_slice %268 {offsets = [0, 0], sizes = [8, 32], strides = [1, 1]} : vector<8x96xf32> to vector<8x32xf32>
    %272 = vector.extract_strided_slice %268 {offsets = [0, 32], sizes = [8, 32], strides = [1, 1]} : vector<8x96xf32> to vector<8x32xf32>
    %273 = vector.extract_strided_slice %268 {offsets = [0, 64], sizes = [8, 32], strides = [1, 1]} : vector<8x96xf32> to vector<8x32xf32>
    %274 = arith.mulf %272, %227 : vector<8x32xf32>
    %275 = arith.mulf %271, %270 : vector<8x32xf32>
    %276 = arith.addf %274, %275 : vector<8x32xf32>
    %277 = math.tanh %276 : vector<8x32xf32>
    %278 = arith.mulf %273, %277 : vector<8x32xf32>
    %c1_i32_91 = arith.constant 1 : i32
    %279 = arith.subi %c5_i32, %c1_i32_91 : i32
    %c8_i32_92 = arith.constant 8 : i32
    %280 = arith.muli %279, %c8_i32_92 : i32
    %281 = arith.index_cast %280 : i32 to index
    %c0_93 = arith.constant 0 : index
    %282 = vector.load %arg8[%281, %c0_93] : memref<64x32xf32, #tpu.memory_space<vmem>>, vector<8x32xf32>
    tpu.vector_store %arg8[%281, %c0_93], %278 {strides = array<i32>} : memref<64x32xf32, #tpu.memory_space<vmem>>, vector<8x32xf32>,
    %c6_i32 = arith.constant 6 : i32
    %c8_i32_94 = arith.constant 8 : i32
    %283 = arith.muli %c6_i32, %c8_i32_94 : i32
    %284 = arith.index_cast %283 : i32 to index
    %c0_95 = arith.constant 0 : index
    %285 = vector.load %arg9[%284, %c0_95] : memref<64x256xf32, #tpu.memory_space<vmem>>, vector<8x256xf32>
    %cst_96 = arith.constant dense<0.000000e+00> : vector<8x256xf32>
    %286 = tpu.matmul %256, %7, %cst_96 {dimension_numbers = #tpu.dot_dimension_numbers<[1], [0], [0], [1], [0, 0, 1, 1], [], []>} : vector<8x64xf32>, vector<64x256xf32>, vector<8x256xf32> -> vector<8x256xf32>
    %287 = arith.addf %285, %286 : vector<8x256xf32>
    %288 = vector.extract_strided_slice %287 {offsets = [0, 0], sizes = [8, 192], strides = [1, 1]} : vector<8x256xf32> to vector<8x192xf32>
    %cst_97 = arith.constant 5.000000e-01 : f32
    %289 = vector.broadcast %cst_97 : f32 to vector<8x192xf32>
    %290 = arith.mulf %289, %288 : vector<8x192xf32>
    %291 = math.tanh %290 : vector<8x192xf32>
    %cst_98 = arith.constant 5.000000e-01 : f32
    %292 = vector.broadcast %cst_98 : f32 to vector<8x192xf32>
    %293 = arith.mulf %292, %291 : vector<8x192xf32>
    %cst_99 = arith.constant 5.000000e-01 : f32
    %294 = vector.broadcast %cst_99 : f32 to vector<8x192xf32>
    %295 = arith.addf %293, %294 : vector<8x192xf32>
    %296 = vector.extract_strided_slice %287 {offsets = [0, 192], sizes = [8, 64], strides = [1, 1]} : vector<8x256xf32> to vector<8x64xf32>
    %297 = math.tanh %296 : vector<8x64xf32>
    %298 = vector.extract_strided_slice %295 {offsets = [0, 0], sizes = [8, 64], strides = [1, 1]} : vector<8x192xf32> to vector<8x64xf32>
    %299 = vector.extract_strided_slice %295 {offsets = [0, 64], sizes = [8, 64], strides = [1, 1]} : vector<8x192xf32> to vector<8x64xf32>
    %300 = vector.extract_strided_slice %295 {offsets = [0, 128], sizes = [8, 64], strides = [1, 1]} : vector<8x192xf32> to vector<8x64xf32>
    %301 = arith.mulf %299, %254 : vector<8x64xf32>
    %302 = arith.mulf %298, %297 : vector<8x64xf32>
    %303 = arith.addf %301, %302 : vector<8x64xf32>
    %304 = math.tanh %303 : vector<8x64xf32>
    %305 = arith.mulf %300, %304 : vector<8x64xf32>
    %cst_100 = arith.constant dense<0.000000e+00> : vector<8x128xf32>
    %306 = tpu.matmul %256, %8, %cst_100 {dimension_numbers = #tpu.dot_dimension_numbers<[1], [0], [0], [1], [0, 0, 1, 1], [], []>} : vector<8x64xf32>, vector<64x128xf32>, vector<8x128xf32> -> vector<8x128xf32>
    %cst_101 = arith.constant dense<0.000000e+00> : vector<8x128xf32>
    %307 = tpu.matmul %278, %9, %cst_101 {dimension_numbers = #tpu.dot_dimension_numbers<[1], [0], [0], [1], [0, 0, 1, 1], [], []>} : vector<8x32xf32>, vector<32x128xf32>, vector<8x128xf32> -> vector<8x128xf32>
    %308 = arith.addf %306, %307 : vector<8x128xf32>
    %309 = arith.addf %308, %12 : vector<8x128xf32>
    %310 = vector.extract_strided_slice %309 {offsets = [0, 0], sizes = [8, 96], strides = [1, 1]} : vector<8x128xf32> to vector<8x96xf32>
    %cst_102 = arith.constant 5.000000e-01 : f32
    %311 = vector.broadcast %cst_102 : f32 to vector<8x96xf32>
    %312 = arith.mulf %311, %310 : vector<8x96xf32>
    %313 = math.tanh %312 : vector<8x96xf32>
    %cst_103 = arith.constant 5.000000e-01 : f32
    %314 = vector.broadcast %cst_103 : f32 to vector<8x96xf32>
    %315 = arith.mulf %314, %313 : vector<8x96xf32>
    %cst_104 = arith.constant 5.000000e-01 : f32
    %316 = vector.broadcast %cst_104 : f32 to vector<8x96xf32>
    %317 = arith.addf %315, %316 : vector<8x96xf32>
    %318 = vector.extract_strided_slice %309 {offsets = [0, 96], sizes = [8, 32], strides = [1, 1]} : vector<8x128xf32> to vector<8x32xf32>
    %319 = math.tanh %318 : vector<8x32xf32>
    %320 = vector.extract_strided_slice %317 {offsets = [0, 0], sizes = [8, 32], strides = [1, 1]} : vector<8x96xf32> to vector<8x32xf32>
    %321 = vector.extract_strided_slice %317 {offsets = [0, 32], sizes = [8, 32], strides = [1, 1]} : vector<8x96xf32> to vector<8x32xf32>
    %322 = vector.extract_strided_slice %317 {offsets = [0, 64], sizes = [8, 32], strides = [1, 1]} : vector<8x96xf32> to vector<8x32xf32>
    %323 = arith.mulf %321, %276 : vector<8x32xf32>
    %324 = arith.mulf %320, %319 : vector<8x32xf32>
    %325 = arith.addf %323, %324 : vector<8x32xf32>
    %326 = math.tanh %325 : vector<8x32xf32>
    %327 = arith.mulf %322, %326 : vector<8x32xf32>
    %c1_i32_105 = arith.constant 1 : i32
    %328 = arith.subi %c6_i32, %c1_i32_105 : i32
    %c8_i32_106 = arith.constant 8 : i32
    %329 = arith.muli %328, %c8_i32_106 : i32
    %330 = arith.index_cast %329 : i32 to index
    %c0_107 = arith.constant 0 : index
    %331 = vector.load %arg8[%330, %c0_107] : memref<64x32xf32, #tpu.memory_space<vmem>>, vector<8x32xf32>
    tpu.vector_store %arg8[%330, %c0_107], %327 {strides = array<i32>} : memref<64x32xf32, #tpu.memory_space<vmem>>, vector<8x32xf32>,
    %c7_i32 = arith.constant 7 : i32
    %c8_i32_108 = arith.constant 8 : i32
    %332 = arith.muli %c7_i32, %c8_i32_108 : i32
    %333 = arith.index_cast %332 : i32 to index
    %c0_109 = arith.constant 0 : index
    %334 = vector.load %arg9[%333, %c0_109] : memref<64x256xf32, #tpu.memory_space<vmem>>, vector<8x256xf32>
    %cst_110 = arith.constant dense<0.000000e+00> : vector<8x256xf32>
    %335 = tpu.matmul %305, %7, %cst_110 {dimension_numbers = #tpu.dot_dimension_numbers<[1], [0], [0], [1], [0, 0, 1, 1], [], []>} : vector<8x64xf32>, vector<64x256xf32>, vector<8x256xf32> -> vector<8x256xf32>
    %336 = arith.addf %334, %335 : vector<8x256xf32>
    %337 = vector.extract_strided_slice %336 {offsets = [0, 0], sizes = [8, 192], strides = [1, 1]} : vector<8x256xf32> to vector<8x192xf32>
    %cst_111 = arith.constant 5.000000e-01 : f32
    %338 = vector.broadcast %cst_111 : f32 to vector<8x192xf32>
    %339 = arith.mulf %338, %337 : vector<8x192xf32>
    %340 = math.tanh %339 : vector<8x192xf32>
    %cst_112 = arith.constant 5.000000e-01 : f32
    %341 = vector.broadcast %cst_112 : f32 to vector<8x192xf32>
    %342 = arith.mulf %341, %340 : vector<8x192xf32>
    %cst_113 = arith.constant 5.000000e-01 : f32
    %343 = vector.broadcast %cst_113 : f32 to vector<8x192xf32>
    %344 = arith.addf %342, %343 : vector<8x192xf32>
    %345 = vector.extract_strided_slice %336 {offsets = [0, 192], sizes = [8, 64], strides = [1, 1]} : vector<8x256xf32> to vector<8x64xf32>
    %346 = math.tanh %345 : vector<8x64xf32>
    %347 = vector.extract_strided_slice %344 {offsets = [0, 0], sizes = [8, 64], strides = [1, 1]} : vector<8x192xf32> to vector<8x64xf32>
    %348 = vector.extract_strided_slice %344 {offsets = [0, 64], sizes = [8, 64], strides = [1, 1]} : vector<8x192xf32> to vector<8x64xf32>
    %349 = vector.extract_strided_slice %344 {offsets = [0, 128], sizes = [8, 64], strides = [1, 1]} : vector<8x192xf32> to vector<8x64xf32>
    %350 = arith.mulf %348, %303 : vector<8x64xf32>
    %351 = arith.mulf %347, %346 : vector<8x64xf32>
    %352 = arith.addf %350, %351 : vector<8x64xf32>
    %353 = math.tanh %352 : vector<8x64xf32>
    %354 = arith.mulf %349, %353 : vector<8x64xf32>
    %cst_114 = arith.constant dense<0.000000e+00> : vector<8x128xf32>
    %355 = tpu.matmul %305, %8, %cst_114 {dimension_numbers = #tpu.dot_dimension_numbers<[1], [0], [0], [1], [0, 0, 1, 1], [], []>} : vector<8x64xf32>, vector<64x128xf32>, vector<8x128xf32> -> vector<8x128xf32>
    %cst_115 = arith.constant dense<0.000000e+00> : vector<8x128xf32>
    %356 = tpu.matmul %327, %9, %cst_115 {dimension_numbers = #tpu.dot_dimension_numbers<[1], [0], [0], [1], [0, 0, 1, 1], [], []>} : vector<8x32xf32>, vector<32x128xf32>, vector<8x128xf32> -> vector<8x128xf32>
    %357 = arith.addf %355, %356 : vector<8x128xf32>
    %358 = arith.addf %357, %12 : vector<8x128xf32>
    %359 = vector.extract_strided_slice %358 {offsets = [0, 0], sizes = [8, 96], strides = [1, 1]} : vector<8x128xf32> to vector<8x96xf32>
    %cst_116 = arith.constant 5.000000e-01 : f32
    %360 = vector.broadcast %cst_116 : f32 to vector<8x96xf32>
    %361 = arith.mulf %360, %359 : vector<8x96xf32>
    %362 = math.tanh %361 : vector<8x96xf32>
    %cst_117 = arith.constant 5.000000e-01 : f32
    %363 = vector.broadcast %cst_117 : f32 to vector<8x96xf32>
    %364 = arith.mulf %363, %362 : vector<8x96xf32>
    %cst_118 = arith.constant 5.000000e-01 : f32
    %365 = vector.broadcast %cst_118 : f32 to vector<8x96xf32>
    %366 = arith.addf %364, %365 : vector<8x96xf32>
    %367 = vector.extract_strided_slice %358 {offsets = [0, 96], sizes = [8, 32], strides = [1, 1]} : vector<8x128xf32> to vector<8x32xf32>
    %368 = math.tanh %367 : vector<8x32xf32>
    %369 = vector.extract_strided_slice %366 {offsets = [0, 0], sizes = [8, 32], strides = [1, 1]} : vector<8x96xf32> to vector<8x32xf32>
    %370 = vector.extract_strided_slice %366 {offsets = [0, 32], sizes = [8, 32], strides = [1, 1]} : vector<8x96xf32> to vector<8x32xf32>
    %371 = vector.extract_strided_slice %366 {offsets = [0, 64], sizes = [8, 32], strides = [1, 1]} : vector<8x96xf32> to vector<8x32xf32>
    %372 = arith.mulf %370, %325 : vector<8x32xf32>
    %373 = arith.mulf %369, %368 : vector<8x32xf32>
    %374 = arith.addf %372, %373 : vector<8x32xf32>
    %375 = math.tanh %374 : vector<8x32xf32>
    %376 = arith.mulf %371, %375 : vector<8x32xf32>
    %c1_i32_119 = arith.constant 1 : i32
    %377 = arith.subi %c7_i32, %c1_i32_119 : i32
    %c8_i32_120 = arith.constant 8 : i32
    %378 = arith.muli %377, %c8_i32_120 : i32
    %379 = arith.index_cast %378 : i32 to index
    %c0_121 = arith.constant 0 : index
    %380 = vector.load %arg8[%379, %c0_121] : memref<64x32xf32, #tpu.memory_space<vmem>>, vector<8x32xf32>
    tpu.vector_store %arg8[%379, %c0_121], %376 {strides = array<i32>} : memref<64x32xf32, #tpu.memory_space<vmem>>, vector<8x32xf32>,
    %c7_i32_122 = arith.constant 7 : i32
    %cst_123 = arith.constant dense<0.000000e+00> : vector<8x128xf32>
    %381 = tpu.matmul %354, %8, %cst_123 {dimension_numbers = #tpu.dot_dimension_numbers<[1], [0], [0], [1], [0, 0, 1, 1], [], []>} : vector<8x64xf32>, vector<64x128xf32>, vector<8x128xf32> -> vector<8x128xf32>
    %cst_124 = arith.constant dense<0.000000e+00> : vector<8x128xf32>
    %382 = tpu.matmul %376, %9, %cst_124 {dimension_numbers = #tpu.dot_dimension_numbers<[1], [0], [0], [1], [0, 0, 1, 1], [], []>} : vector<8x32xf32>, vector<32x128xf32>, vector<8x128xf32> -> vector<8x128xf32>
    %383 = arith.addf %381, %382 : vector<8x128xf32>
    %384 = arith.addf %383, %12 : vector<8x128xf32>
    %385 = vector.extract_strided_slice %384 {offsets = [0, 0], sizes = [8, 96], strides = [1, 1]} : vector<8x128xf32> to vector<8x96xf32>
    %cst_125 = arith.constant 5.000000e-01 : f32
    %386 = vector.broadcast %cst_125 : f32 to vector<8x96xf32>
    %387 = arith.mulf %386, %385 : vector<8x96xf32>
    %388 = math.tanh %387 : vector<8x96xf32>
    %cst_126 = arith.constant 5.000000e-01 : f32
    %389 = vector.broadcast %cst_126 : f32 to vector<8x96xf32>
    %390 = arith.mulf %389, %388 : vector<8x96xf32>
    %cst_127 = arith.constant 5.000000e-01 : f32
    %391 = vector.broadcast %cst_127 : f32 to vector<8x96xf32>
    %392 = arith.addf %390, %391 : vector<8x96xf32>
    %393 = vector.extract_strided_slice %384 {offsets = [0, 96], sizes = [8, 32], strides = [1, 1]} : vector<8x128xf32> to vector<8x32xf32>
    %394 = math.tanh %393 : vector<8x32xf32>
    %395 = vector.extract_strided_slice %392 {offsets = [0, 0], sizes = [8, 32], strides = [1, 1]} : vector<8x96xf32> to vector<8x32xf32>
    %396 = vector.extract_strided_slice %392 {offsets = [0, 32], sizes = [8, 32], strides = [1, 1]} : vector<8x96xf32> to vector<8x32xf32>
    %397 = vector.extract_strided_slice %392 {offsets = [0, 64], sizes = [8, 32], strides = [1, 1]} : vector<8x96xf32> to vector<8x32xf32>
    %398 = arith.mulf %396, %374 : vector<8x32xf32>
    %399 = arith.mulf %395, %394 : vector<8x32xf32>
    %400 = arith.addf %398, %399 : vector<8x32xf32>
    %401 = math.tanh %400 : vector<8x32xf32>
    %402 = arith.mulf %397, %401 : vector<8x32xf32>
    %c56 = arith.constant 56 : index
    %c0_128 = arith.constant 0 : index
    %403 = vector.load %arg8[%c56, %c0_128] : memref<64x32xf32, #tpu.memory_space<vmem>>, vector<8x32xf32>
    tpu.vector_store %arg8[%c56, %c0_128], %402 {strides = array<i32>} : memref<64x32xf32, #tpu.memory_space<vmem>>, vector<8x32xf32>,
    return
  }
  func.func @transform_0(%arg0: i32) -> (i32, i32) {
    %c0_i32 = arith.constant 0 : i32
    %c0_i32_0 = arith.constant 0 : i32
    %c0_i32_1 = arith.constant 0 : i32
    return %c0_i32, %c0_i32_0 : i32, i32
  }
  func.func @transform_1(%arg0: i32) -> (i32, i32) {
    %c0_i32 = arith.constant 0 : i32
    %c0_i32_0 = arith.constant 0 : i32
    %c0_i32_1 = arith.constant 0 : i32
    return %c0_i32, %c0_i32_0 : i32, i32
  }
  func.func @transform_2(%arg0: i32) -> (i32, i32) {
    %c0_i32 = arith.constant 0 : i32
    %c0_i32_0 = arith.constant 0 : i32
    %c0_i32_1 = arith.constant 0 : i32
    return %c0_i32, %c0_i32_0 : i32, i32
  }
  func.func @transform_3(%arg0: i32) -> (i32, i32) {
    %c0_i32 = arith.constant 0 : i32
    %c0_i32_0 = arith.constant 0 : i32
    %c0_i32_1 = arith.constant 0 : i32
    return %c0_i32, %c0_i32_0 : i32, i32
  }
  func.func @transform_4(%arg0: i32) -> (i32, i32) {
    %c0_i32 = arith.constant 0 : i32
    %c0_i32_0 = arith.constant 0 : i32
    %c0_i32_1 = arith.constant 0 : i32
    return %c0_i32, %c0_i32_0 : i32, i32
  }
  func.func @transform_5(%arg0: i32) -> (i32, i32) {
    %c0_i32 = arith.constant 0 : i32
    %c0_i32_0 = arith.constant 0 : i32
    %c0_i32_1 = arith.constant 0 : i32
    return %c0_i32, %c0_i32_0 : i32, i32
  }
  func.func @transform_6(%arg0: i32) -> (i32, i32) {
    %c0_i32 = arith.constant 0 : i32
    %c0_i32_0 = arith.constant 0 : i32
    %c0_i32_1 = arith.constant 0 : i32
    return %c0_i32, %c0_i32_0 : i32, i32
  }
  func.func @transform_7(%arg0: i32) -> (i32, i32) {
    %c0_i32 = arith.constant 0 : i32
    %c0_i32_0 = arith.constant 0 : i32
    %c0_i32_1 = arith.constant 0 : i32
    return %c0_i32, %c0_i32_0 : i32, i32
  }
}

</mosaic_0001>

<bundles_post_ra>
// kernel: autoencoder_forward.1
= control target key start
LH: loop header
LB: loop body
LE: loop exit
PB: predicated region body
PF: predicated region fallthrough
CT: control target
= control target key end

     0   :  { %12 = vsyncpa [#allocation4], 0  ;;  %s3294_s24 = smov [#allocation3]   ;;  %s3859_s0 = inlined_call_operand.vmem [shape: f32[64,4], index: 0, kind: input, shape index: {}]   ;;  %s3860_s1 = inlined_call_operand.vmem [shape: f32[4,256], index: 1, kind: input, shape index: {}]   ;;  %s3861_s2 = inlined_call_operand.hbm [shape: f32[64,256], index: 2, kind: input, shape index: {}]   ;;  %s3862_s3 = inlined_call_operand.vmem [shape: f32[1,256], index: 3, kind: input, shape index: {}]   ;;  %s3863_s4 = inlined_call_operand.vmem [shape: f32[64,128], index: 4, kind: input, shape index: {}]   ;;  %s3864_s5 = inlined_call_operand.vmem [shape: f32[32,128], index: 5, kind: input, shape index: {}]   ;;  %s3865_s6 = inlined_call_operand.vmem [shape: f32[1,128], index: 6, kind: input, shape index: {}]   ;;  %s3866_s7 = inlined_call_operand.vmem [shape: f32[64,32], index: 7, kind: output, shape index: {}]  }
   0x1   :  { %s22_s25 = sshll.u32 %s3294_s24, 4  ;;  %s3270_s28 = scalar_lea.hbm %s3861_s2, 2048  ;;  %s23_s25 = int_to_ptr.vmem [resolvable:$true] %s22_s25 }
   0x2   :  { %p3271_p0 = scmp.ne.s32.totalorder %s3861_s2, %s3270_s28  ;;  %p3274_p1 = scmp.lt.u32.totalorder %s3270_s28, %s3861_s2 }
   0x4   :  { %p3276_p2 = pnand %p3274_p1, %p3271_p0 }
   0x6   :  { %3279 = shalt.err (!%p3276_p2)
}
   0x7   :  { %s3280_s10 = scalar_lea.vmem %s23_s25, 2048  ;;  %p3285_p4 = scmp.lt.s32.totalorder %s23_s25, %s23_s25 }
   0x8   :  { %p3281_p3 = scmp.ne.s32.totalorder %s23_s25, %s3280_s10  ;;  %p3286_p5 = scmp.lt.s32.totalorder %s3280_s10, %s3280_s10 }
   0xa   :  { %p3287_p6 = por %p3286_p5, %p3285_p4 }
   0xc   :  { %p3288_p7 = pnand %p3287_p6, %p3281_p3 }
   0xe   :  { %3291 = shalt.err (!%p3288_p7)
}
   0xf   :  { %s3295_s11 = smov 256   ;;  %s3296_s12 = smov 16  }
  0x10   :  { %28 = dma.hbm_to_vmem [thread:$0]  %s3861_s2, 2048, %s23_s25, [#allocation4], %s3295_s11, %s3295_s11, %s3296_s12  }
  0x11   :  { %3292 = dma.done.wait [#allocation4], 2048  }
  0x12   :  { %3293 = vsyncadd [#allocation4], 4294965248  ;;  %v3297_v0 = vmov 0.0   ;;  %v48_v1 = vld [vmem:[%s3860_s1] sm:$0xff]  ;;  %vm88_vm0 = vcmask 1043456   ;;  %v223_v2 = vld [vmem:[#allocation3 + $0x8] sm:$0xff]  ;;  %v51_v35 = vlaneseq }
  0x13   :  { %157 = vmatprep.mubr.f32.mxu0 %v3297_v0  ;;  %v62_v3 = vcombine.high %v48_v1, %v48_v1  ;;  %v225_v4 = vld [vmem:[#allocation3 + $0x18] sm:$0xff]  ;;  %v222_v5 = vld [vmem:[#allocation3] sm:$0xff]  ;;  %v224_v6 = vld [vmem:[#allocation3 + $0x10] sm:$0xff]  ;;  %vm63_vm1 = vcmask 31744   ;;  %s3298_s9 = smov 64   ;;  %v3299_v56 = vmov 0.0|0.0  }
  0x14   :  { %v40_v7 = vld [vmem:[%s3859_s0] sm:$0xff]  ;;  %v3361_v8 = vpack.c.bf16 %v225_v4, %v223_v2  ;;  %v3363_v9 = vpack.c.bf16 %v224_v6, %v222_v5  ;;  %v227_v10 = vld [vmem:[#allocation3 + $0x28] sm:$0xff]  ;;  %v229_v11 = vld [vmem:[#allocation3 + $0x38] sm:$0xff]  ;;  %v52_v36 = vshrl.u32 %v51_v35, 7  ;;  %2882 = vmatprep.subr.bf16.mxu1 %v3299_v56  ;;  %vm3300_vm2 = vmmov 0  }
  0x15   :  { %2459 = vmatprep.subr.msk.mxu0 %vm88_vm0, %v62_v3  ;;  %v226_v12 = vld [vmem:[#allocation3 + $0x20] sm:$0xff]  ;;  %v228_v13 = vld [vmem:[#allocation3 + $0x30] sm:$0xff]  ;;  %v3365_v14 = vpack.c.bf16 %v229_v11, %v227_v10  ;;  %v231_v15 = vld [vmem:[#allocation3 + $0x48] sm:$0xff]  ;;  %2631 = vmatprep.mubr.msk.f32.mxu1 %vm3300_vm2, %v3297_v0  ;;  %vm259_vm3 = vcmask 523264   ;;  %vm466_vm4 = vcmask 261120  }
  0x16   :  { %2460 = vmatpush1.msk.msra.mxu0 %vm88_vm0, %v48_v1  ;;  %v233_v16 = vld [vmem:[#allocation3 + $0x58] sm:$0xff]  ;;  %v41_v17 = vld [vmem:[%s3859_s0 + $0x8] sm:$0xff]  ;;  %v3374_v18 = vpack.c.bf16 %v228_v13, %v226_v12  ;;  %v230_v20 = vld [vmem:[#allocation3 + $0x40] sm:$0xff]  ;;  %v57_v37 = vsub.s32 1, %v52_v36  ;;  %v53_v44 = vsub.s32 0, %v52_v36 }
  0x17   :  { %2461 = vmatmul.mubr.msk.f32.vlgmr.msra.gmra.mrb[0].mxu0 %vm63_vm1, %v40_v7  ;;  %2845 = vmatprep.subr.bf16.mxu0 %v3361_v8  ;;  %v3377_v19 = vpack.c.bf16 %v233_v16, %v231_v15  ;;  %v232_v21 = vld [vmem:[#allocation3 + $0x50] sm:$0xff]  ;;  %v235_v22 = vld [vmem:[#allocation3 + $0x68] sm:$0xff]  ;;  %v237_v23 = vld [vmem:[#allocation3 + $0x78] sm:$0xff] }
  0x18   :  { %2847 = vmatpush1.bf16.msra.mxu0 %v3363_v9  ;;  %163 = vmatprep.mubr.f32.mxu0 %v3297_v0  ;;  %v42_v24 = vld [vmem:[%s3859_s0 + $0x10] sm:$0xff]  ;;  %v3385_v25 = vpack.c.bf16 %v232_v21, %v230_v20  ;;  %v3388_v26 = vpack.c.bf16 %v237_v23, %v235_v22  ;;  %v234_v27 = vld [vmem:[#allocation3 + $0x60] sm:$0xff]  ;;  %v43_v29 = vld [vmem:[%s3859_s0 + $0x18] sm:$0xff] }
  0x19   :  { %2849 = vmatprep.subr.bf16.mxu0 %v3365_v14  ;;  %v236_v28 = vld [vmem:[#allocation3 + $0x70] sm:$0xff]  ;;  %v44_v31 = vld [vmem:[%s3859_s0 + $0x20] sm:$0xff]  ;;  %v45_v32 = vld [vmem:[%s3859_s0 + $0x28] sm:$0xff] }
  0x1a   :  { %v3396_v30 = vpack.c.bf16 %v236_v28, %v234_v27  ;;  %v46_v33 = vld [vmem:[%s3859_s0 + $0x30] sm:$0xff]  ;;  %v47_v34 = vld [vmem:[%s3859_s0 + $0x38] sm:$0xff]  ;;  %v49_v38 = vld [vmem:[%s3862_s3] sm:$0x3]  ;;  %s3301_s0 = smov 32  }
  0x1b   :  { %2462 = vmatmul.mubr.msk.f32.gmra.mrb[2].mxu0 %vm63_vm1, %v41_v17  ;;  %v3435_v39 = vrot.slane %v49_v38, %v57_v37  ;;  %v3439_v45 = vrot.slane %v49_v38, %v53_v44  ;;  %v238_v53 = vld [vmem:[%s3863_s4] sm:$0xff]  ;;  %v239_v54 = vld [vmem:[%s3863_s4 + $0x8] sm:$0xff]  ;;  %v240_v55 = vld [vmem:[%s3863_s4 + $0x10] sm:$0xff] }
  0x1c   :  { %169 = vmatprep.mubr.f32.mxu0 %v3297_v0  ;;  %2851 = vmatpush1.bf16.msra.mxu0 %v3374_v18  ;;  %v3453_v57 = vpack.c.bf16 %v239_v54, %v238_v53  ;;  %v241_v58 = vld [vmem:[%s3863_s4 + $0x18] sm:$0xff]  ;;  %v242_v60 = vld [vmem:[%s3863_s4 + $0x20] sm:$0xff]  ;;  %v243_v61 = vld [vmem:[%s3863_s4 + $0x28] sm:$0xff] }
  0x1d   :  { %2853 = vmatprep.subr.bf16.mxu0 %v3377_v19  ;;  %v3460_v59 = vpack.c.bf16 %v241_v58, %v240_v55  ;;  %v3470_v62 = vpack.c.bf16 %v243_v61, %v242_v60  ;;  %v244_v63 = vld [vmem:[%s3863_s4 + $0x30] sm:$0xff]  ;;  %v245_v1 = vld [vmem:[%s3863_s4 + $0x38] sm:$0xff]  ;;  %v246_v12 = vld [vmem:[%s3864_s5] sm:$0xff] }
  0x1e   :  { %2884 = vmatpush3.bf16.msra.mxu1 %v3453_v57  ;;  %v3480_v2 = vpack.c.bf16 %v245_v1, %v244_v63  ;;  %v247_v13 = vld [vmem:[%s3864_s5 + $0x8] sm:$0xff]  ;;  %v248_v21 = vld [vmem:[%s3864_s5 + $0x10] sm:$0xff]  ;;  %v249_v22 = vld [vmem:[%s3864_s5 + $0x18] sm:$0xff] }
  0x1f   :  { %2463 = vmatmul.mubr.msk.f32.gmra.mrb[4].mxu0 %vm63_vm1, %v42_v24  ;;  %2885 = vmatprep.subr.bf16.mxu1 %v3299_v56  ;;  %v3497_v17 = vpack.c.bf16 %v247_v13, %v246_v12  ;;  %v3508_v23 = vpack.c.bf16 %v249_v22, %v248_v21 }
  0x20   :  { %175 = vmatprep.mubr.f32.mxu0 %v3297_v0  ;;  %2855 = vmatpush1.bf16.msra.mxu0 %v3385_v25 }
  0x21   :  { %2857 = vmatprep.subr.bf16.mxu0 %v3388_v26 }
  0x22   :  { %2887 = vmatpush3.bf16.msra.mxu1 %v3460_v59 }
  0x23   :  { %2464 = vmatmul.mubr.msk.f32.gmra.mrb[6].mxu0 %vm63_vm1, %v43_v29  ;;  %2888 = vmatprep.subr.bf16.mxu1 %v3299_v56 }
  0x24   :  { %181 = vmatprep.mubr.f32.mxu0 %v3297_v0  ;;  %2859 = vmatpush1.bf16.msra.mxu0 %v3396_v30 }
  0x25   :  { %2861 = vmatprep.subr.bf16.mxu0 %v3361_v8 }
  0x26   :  { %2890 = vmatpush3.bf16.msra.mxu1 %v3470_v62 }
  0x27   :  { %2465 = vmatmul.mubr.msk.f32.gmra.mrb[8].mxu0 %vm63_vm1, %v44_v31  ;;  %2891 = vmatprep.subr.bf16.mxu1 %v3299_v56  ;;  %v3534_v31 = vld [vmem:[%s3865_s6] ss:$0 sm:$0xff] }
  0x28   :  { %187 = vmatprep.mubr.f32.mxu0 %v3297_v0 }
  0x2a   :  { %2893 = vmatpush3.bf16.msra.mxu1 %v3480_v2 }
  0x2b   :  { %2466 = vmatmul.mubr.msk.f32.gmra.mrb[10].mxu0 %vm63_vm1, %v45_v32  ;;  %2910 = vmatprep.subr.bf16.mxu1 %v3299_v56 }
  0x2c   :  { %193 = vmatprep.mubr.f32.mxu0 %v3297_v0 }
  0x2f   :  { %2467 = vmatmul.mubr.msk.f32.gmra.mrb[12].mxu0 %vm63_vm1, %v46_v33 }
  0x30   :  { %199 = vmatprep.mubr.f32.mxu0 %v3297_v0 }
  0x33   :  { %2468 = vmatmul.mubr.msk.f32.gmra.mrb[14].mxu0 %vm63_vm1, %v47_v34 }
  0x34   :  { %327 = vmatprep.mubr.f32.mxu0 %v3297_v0 }
  0x37   :  { %328 = vmatmul.mubr.f32.vlgmr.msra.gmra.mrb[0].mxu0 %v3297_v0 }
  0x38   :  { %2863 = vmatpush1.bf16.msra.mxu0 %v3363_v9  ;;  %431 = vmatprep.mubr.f32.mxu0 %v3297_v0 }
  0x39   :  { %2865 = vmatprep.subr.bf16.mxu0 %v3365_v14 }
  0x3c   :  { %2867 = vmatpush1.bf16.msra.mxu0 %v3374_v18 }
  0x3d   :  { %2869 = vmatprep.subr.bf16.mxu0 %v3377_v19 }
  0x40   :  { %2871 = vmatpush1.bf16.msra.mxu0 %v3385_v25 }
  0x41   :  { %2873 = vmatprep.subr.bf16.mxu0 %v3388_v26 }
  0x44   :  { %2875 = vmatpush1.bf16.msra.mxu0 %v3396_v30 }
  0x45   :  { %2876 = vmatprep.subr.bf16.mxu0 %v3299_v56 }
 0x10a   :  { %v329_v40 = vpop.f32.mrb[0].mxu0 }
 0x10b   :  { %v331_v41 = vpop.f32.mrb[1].mxu0  ;;  %v3116_v46 = vadd.f32 %v329_v40, %v3439_v45 }
 0x10c   :  { %v3117_v42 = vadd.f32 %v331_v41, %v3435_v39 }
 0x10d   :  { %v336_v47 = vmul.f32 0.5, %v3116_v46 }
 0x10e   :  { %3157 = vtanh.f32 %v3117_v42  ;;  %v337_v7 = vmul.f32 0.5, %v3117_v42 }
 0x10f   :  { %3159 = vtanh.f32 %v336_v47 }
 0x118   :  { %v3158_v43 = vpop.eup %3157 }
 0x119   :  { %347 = vrot.lane.b32.xlu0 %v3158_v43, %s3298_s9  ;;  %v3160_v48 = vpop.eup %3159 }
 0x11a   :  { %v340_v49 = vmul.f32 0.5, %v3160_v48 }
 0x11c   :  { %v342_v50 = vadd.f32 0.5, %v340_v49 }
 0x11e   :  { %v345_v3 = vmul.f32 0.0, %v342_v50 }
 0x18b   :  { %v348_v51 = vpop.permute.xlu0 %347 }
 0x18c   :  { %v350_v52 = vmul.f32 %v348_v51, %v342_v50 }
 0x18e   :  { %352 = vrot.lane.b32.xlu0 %v350_v52, %s3298_s9 }
 0x200   :  { %v353_v4 = vpop.permute.xlu0 %352 }
 0x201   :  { %v3485_v5 = vadd.f32 %v353_v4, %v345_v3 }
 0x203   :  { %3161 = vtanh.f32 %v3485_v5 }
 0x204   :  { %3163 = vtanh.f32 %v337_v7 }
 0x20d   :  { %v3162_v6 = vpop.eup %3161 }
 0x20e   :  { %358 = vrot.lane.b32.xlu1 %v3162_v6, %s3298_s9  ;;  %v3164_v10 = vpop.eup %3163 }
 0x20f   :  { %v341_v11 = vmul.f32 0.5, %v3164_v10 }
 0x211   :  { %v343_v15 = vadd.f32 0.5, %v341_v11 }
 0x280   :  { %v359_v16 = vpop.permute.xlu1 %358 }
 0x281   :  { %v361_v20 = vmul.f32 %v359_v16, %v343_v15 }
 0x283   :  { %2470 = vmatmul.mubr.msk.f32.vlgmr.msra.gmra.mrb[2].mxu0 %vm259_vm3, %v361_v20  ;;  %2632 = vmatmul.mubr.msk.f32.vlgmr.msra.gmra.mrb[0].mxu1 %vm259_vm3, %v361_v20 }
 0x284   :  { %2878 = vmatpush3.bf16.msra.mxu0 %v3497_v17  ;;  %2612 = vmatprep.mubr.msk.f32.mxu0 %vm3300_vm2, %v3297_v0 }
 0x285   :  { %2879 = vmatprep.subr.bf16.mxu0 %v3299_v56  ;;  %2912 = vmatpush3.bf16.msra.mxu1 %v3497_v17 }
 0x286   :  { %2913 = vmatprep.subr.bf16.mxu1 %v3299_v56  ;;  %2642 = vmatprep.mubr.msk.f32.mxu1 %vm3300_vm2, %v3297_v0 }
 0x288   :  { %2881 = vmatpush3.bf16.msra.mxu0 %v3508_v23 }
 0x289   :  { %2895 = vmatprep.subr.bf16.mxu0 %v3361_v8  ;;  %2915 = vmatpush3.bf16.msra.mxu1 %v3508_v23 }
 0x28a   :  { %2916 = vmatprep.subr.bf16.mxu1 %v3299_v56 }
 0x28b   :  { %2613 = vmatmul.mubr.f32.vlgmr.msra.gmra.mrb[16].mxu0 %v3297_v0 }
 0x28c   :  { %2897 = vmatpush1.bf16.msra.mxu0 %v3363_v9  ;;  %706 = vmatprep.mubr.f32.mxu0 %v3297_v0 }
 0x28d   :  { %2899 = vmatprep.subr.bf16.mxu0 %v3365_v14 }
 0x290   :  { %2901 = vmatpush1.bf16.msra.mxu0 %v3374_v18 }
 0x291   :  { %2903 = vmatprep.subr.bf16.mxu0 %v3377_v19 }
 0x294   :  { %2905 = vmatpush1.bf16.msra.mxu0 %v3385_v25 }
 0x295   :  { %2907 = vmatprep.subr.bf16.mxu0 %v3388_v26 }
 0x298   :  { %2909 = vmatpush1.bf16.msra.mxu0 %v3396_v30 }
 0x299   :  { %2929 = vmatprep.subr.bf16.mxu0 %v3361_v8 }
 0x356   :  { %v433_v24 = vpop.f32.mrb[2].mxu0  ;;  %v605_v27 = vpop.f32.mrb[0].mxu1 }
 0x357   :  { %v435_v28 = vpop.f32.mrb[3].mxu0  ;;  %v2633_v29 = vpop.f32.mrb[1].mxu1  ;;  %v3118_v40 = vadd.f32 %v433_v24, %v3439_v45 }
 0x358   :  { %v3119_v36 = vadd.f32 %v435_v28, %v3435_v39 }
 0x359   :  { %v440_v42 = vmul.f32 0.5, %v3118_v40 }
 0x35a   :  { %v441_v4 = vmul.f32 0.5, %v3119_v36 }
 0x35e   :  { %v535_v32 = vpop.f32.mrb[16].mxu0 }
 0x35f   :  { %v606_v33 = vadd.f32 %v605_v27, %v535_v32  ;;  %v2614_v34 = vpop.f32.mrb[17].mxu0 }
 0x361   :  { %v609_v35 = vadd.f32 %v3534_v31, %v606_v33 }
 0x363   :  { %3165 = vtanh.f32 %v609_v35  ;;  %v610_v41 = vmul.f32 0.5, %v609_v35 }
 0x364   :  { %3167 = vtanh.f32 %v3119_v36 }
 0x365   :  { %3169 = vtanh.f32 %v610_v41 }
 0x366   :  { %3171 = vtanh.f32 %v440_v42 }
 0x36d   :  { %v3166_v37 = vpop.eup %3165 }
 0x36e   :  { %617 = vrot.lane.b32.xlu1 %v3166_v37, %s3301_s0  ;;  %v3168_v38 = vpop.eup %3167 }
 0x36f   :  { %v3170_v43 = vpop.eup %3169 }
 0x370   :  { %v612_v44 = vmul.f32 0.5, %v3170_v43  ;;  %v3172_v46 = vpop.eup %3171 }
 0x371   :  { %v444_v48 = vmul.f32 0.5, %v3172_v46 }
 0x372   :  { %451 = vrot.lane.b32.xlu1 %v3168_v38, %s3298_s9  ;;  %v613_v47 = vadd.f32 0.5, %v612_v44 }
 0x373   :  { %v446_v51 = vadd.f32 0.5, %v444_v48 }
 0x374   :  { %v615_v54 = vmul.f32 0.0, %v613_v47 }
 0x375   :  { %v449_v60 = vmul.f32 %v446_v51, %v3485_v5 }
 0x3e0   :  { %v618_v49 = vpop.permute.xlu1 %617 }
 0x3e1   :  { %v620_v50 = vmul.f32 %v618_v49, %v613_v47 }
 0x3e3   :  { %622 = vrot.lane.b32.xlu0 %v620_v50, %s3301_s0 }
 0x3e4   :  { %v452_v52 = vpop.permute.xlu1 %451 }
 0x3e5   :  { %v454_v53 = vmul.f32 %v452_v52, %v446_v51 }
 0x3e7   :  { %456 = vrot.lane.b32.xlu1 %v454_v53, %s3298_s9 }
 0x455   :  { %v623_v55 = vpop.permute.xlu0 %622 }
 0x456   :  { %v3543_v58 = vadd.f32 %v623_v55, %v615_v54 }
 0x458   :  { %3173 = vtanh.f32 %v3543_v58 }
 0x459   :  { %v457_v61 = vpop.permute.xlu1 %456 }
 0x45a   :  { %v3547_v63 = vadd.f32 %v457_v61, %v449_v60 }
 0x45c   :  { %3175 = vtanh.f32 %v3547_v63 }
 0x45d   :  { %3177 = vtanh.f32 %v441_v4 }
 0x462   :  { %v3174_v1 = vpop.eup %3173 }
 0x463   :  { %628 = vrot.lane.b32.xlu0 %v3174_v1, %s3301_s0 }
 0x466   :  { %v3176_v3 = vpop.eup %3175 }
 0x467   :  { %462 = vrot.lane.b32.xlu1 %v3176_v3, %s3298_s9  ;;  %v3178_v6 = vpop.eup %3177 }
 0x468   :  { %v445_v7 = vmul.f32 0.5, %v3178_v6 }
 0x46a   :  { %v447_v5 = vadd.f32 0.5, %v445_v7 }
 0x4d5   :  { %v629_v10 = vpop.permute.xlu0 %628 }
 0x4d6   :  { %v631_v11 = vmul.f32 %v629_v10, %v613_v47 }
 0x4d8   :  { %633 = vrot.lane.b32.xlu0 %v631_v11, %s3298_s9 }
 0x4d9   :  { %v463_v12 = vpop.permute.xlu1 %462 }
 0x4da   :  { %v465_v13 = vmul.f32 %v463_v12, %v447_v5 }
 0x4dc   :  { %2472 = vmatmul.mubr.msk.f32.vlgmr.msra.gmra.mrb[4].mxu0 %vm259_vm3, %v465_v13 }
 0x4dd   :  { %2931 = vmatpush1.bf16.msra.mxu0 %v3363_v9  ;;  %980 = vmatprep.mubr.f32.mxu0 %v3297_v0 }
 0x4de   :  { %2933 = vmatprep.subr.bf16.mxu0 %v3365_v14 }
 0x4e1   :  { %2935 = vmatpush1.bf16.msra.mxu0 %v3374_v18 }
 0x4e2   :  { %2937 = vmatprep.subr.bf16.mxu0 %v3377_v19 }
 0x4e5   :  { %2939 = vmatpush1.bf16.msra.mxu0 %v3385_v25 }
 0x4e6   :  { %2941 = vmatprep.subr.bf16.mxu0 %v3388_v26 }
 0x4e9   :  { %2943 = vmatpush1.bf16.msra.mxu0 %v3396_v30 }
 0x4ea   :  { %2963 = vmatprep.subr.bf16.mxu0 %v3361_v8 }
 0x54a   :  { %v634_v15 = vpop.permute.xlu0 %633 }
 0x54b   :  { %636 = vst.msk [vmem:[%s3866_s7] sm:$0xff] %vm466_vm4, %v634_v15  ;;  %2643 = vmatmul.mubr.msk.f32.vlgmr.msra.gmra.mrb[2].mxu1 %vm466_vm4, %v634_v15 }
 0x54c   :  { %2918 = vmatpush3.bf16.msra.mxu1 %v3453_v57  ;;  %2661 = vmatprep.mubr.msk.f32.mxu1 %vm3300_vm2, %v3297_v0 }
 0x54d   :  { %2919 = vmatprep.subr.bf16.mxu1 %v3299_v56 }
 0x550   :  { %2921 = vmatpush3.bf16.msra.mxu1 %v3460_v59 }
 0x551   :  { %2922 = vmatprep.subr.bf16.mxu1 %v3299_v56 }
 0x554   :  { %2924 = vmatpush3.bf16.msra.mxu1 %v3470_v62 }
 0x555   :  { %2925 = vmatprep.subr.bf16.mxu1 %v3299_v56 }
 0x558   :  { %2927 = vmatpush3.bf16.msra.mxu1 %v3480_v2 }
 0x559   :  { %2944 = vmatprep.subr.bf16.mxu1 %v3299_v56 }
 0x55b   :  { %2662 = vmatmul.mubr.msk.f32.vlgmr.msra.gmra.mrb[4].mxu1 %vm259_vm3, %v465_v13 }
 0x55c   :  { %2946 = vmatpush3.bf16.msra.mxu1 %v3497_v17  ;;  %2672 = vmatprep.mubr.msk.f32.mxu1 %vm3300_vm2, %v3297_v0 }
 0x55d   :  { %2947 = vmatprep.subr.bf16.mxu1 %v3299_v56 }
 0x560   :  { %2949 = vmatpush3.bf16.msra.mxu1 %v3508_v23 }
 0x561   :  { %2950 = vmatprep.subr.bf16.mxu1 %v3299_v56 }
 0x5af   :  { %v708_v16 = vpop.f32.mrb[4].mxu0 }
 0x5b0   :  { %v710_v20 = vpop.f32.mrb[5].mxu0  ;;  %v3120_v35 = vadd.f32 %v708_v16, %v3439_v45 }
 0x5b1   :  { %v3121_v32 = vadd.f32 %v710_v20, %v3435_v39 }
 0x5b2   :  { %v715_v37 = vmul.f32 0.5, %v3120_v35 }
 0x5b3   :  { %v716_v1 = vmul.f32 0.5, %v3121_v32 }
 0x61e   :  { %v809_v21 = vpop.f32.mrb[2].mxu1 }
 0x61f   :  { %v2644_v22 = vpop.f32.mrb[3].mxu1 }
 0x62e   :  { %v879_v24 = vpop.f32.mrb[4].mxu1 }
 0x62f   :  { %v880_v27 = vadd.f32 %v879_v24, %v809_v21  ;;  %v2663_v28 = vpop.f32.mrb[5].mxu1 }
 0x631   :  { %v883_v29 = vadd.f32 %v3534_v31, %v880_v27 }
 0x633   :  { %3179 = vtanh.f32 %v883_v29  ;;  %v884_v36 = vmul.f32 0.5, %v883_v29 }
 0x634   :  { %3181 = vtanh.f32 %v3121_v32 }
 0x635   :  { %3183 = vtanh.f32 %v884_v36 }
 0x636   :  { %3185 = vtanh.f32 %v715_v37 }
 0x63d   :  { %v3180_v33 = vpop.eup %3179 }
 0x63e   :  { %891 = vrot.lane.b32.xlu0 %v3180_v33, %s3301_s0  ;;  %v3182_v34 = vpop.eup %3181 }
 0x63f   :  { %v3184_v38 = vpop.eup %3183 }
 0x640   :  { %v886_v40 = vmul.f32 0.5, %v3184_v38  ;;  %v3186_v41 = vpop.eup %3185 }
 0x641   :  { %v719_v43 = vmul.f32 0.5, %v3186_v41 }
 0x642   :  { %726 = vrot.lane.b32.xlu0 %v3182_v34, %s3298_s9  ;;  %v887_v42 = vadd.f32 0.5, %v886_v40 }
 0x643   :  { %v721_v47 = vadd.f32 0.5, %v719_v43 }
 0x644   :  { %v889_v50 = vmul.f32 %v887_v42, %v3543_v58 }
 0x645   :  { %v724_v53 = vmul.f32 %v721_v47, %v3547_v63 }
 0x6b0   :  { %v892_v44 = vpop.permute.xlu0 %891 }
 0x6b1   :  { %v894_v46 = vmul.f32 %v892_v44, %v887_v42 }
 0x6b3   :  { %896 = vrot.lane.b32.xlu1 %v894_v46, %s3301_s0 }
 0x6b4   :  { %v727_v48 = vpop.permute.xlu0 %726 }
 0x6b5   :  { %v729_v49 = vmul.f32 %v727_v48, %v721_v47 }
 0x6b7   :  { %731 = vrot.lane.b32.xlu0 %v729_v49, %s3298_s9 }
 0x725   :  { %v897_v51 = vpop.permute.xlu1 %896 }
 0x726   :  { %v3593_v52 = vadd.f32 %v897_v51, %v889_v50 }
 0x728   :  { %3187 = vtanh.f32 %v3593_v52 }
 0x729   :  { %v732_v54 = vpop.permute.xlu0 %731 }
 0x72a   :  { %v3597_v55 = vadd.f32 %v732_v54, %v724_v53 }
 0x72c   :  { %3189 = vtanh.f32 %v3597_v55 }
 0x72d   :  { %3191 = vtanh.f32 %v716_v1 }
 0x732   :  { %v3188_v60 = vpop.eup %3187 }
 0x733   :  { %902 = vrot.lane.b32.xlu1 %v3188_v60, %s3301_s0 }
 0x736   :  { %v3190_v61 = vpop.eup %3189 }
 0x737   :  { %737 = vrot.lane.b32.xlu0 %v3190_v61, %s3298_s9  ;;  %v3192_v58 = vpop.eup %3191 }
 0x738   :  { %v720_v3 = vmul.f32 0.5, %v3192_v58 }
 0x73a   :  { %v722_v63 = vadd.f32 0.5, %v720_v3 }
 0x7a5   :  { %v903_v4 = vpop.permute.xlu1 %902 }
 0x7a6   :  { %v905_v6 = vmul.f32 %v903_v4, %v887_v42 }
 0x7a8   :  { %907 = vrot.lane.b32.xlu1 %v905_v6, %s3298_s9 }
 0x7a9   :  { %v738_v7 = vpop.permute.xlu0 %737 }
 0x7aa   :  { %v740_v10 = vmul.f32 %v738_v7, %v722_v63 }
 0x7ac   :  { %2475 = vmatmul.mubr.msk.f32.vlgmr.msra.gmra.mrb[6].mxu0 %vm259_vm3, %v740_v10 }
 0x7ad   :  { %2965 = vmatpush1.bf16.msra.mxu0 %v3363_v9  ;;  %1254 = vmatprep.mubr.f32.mxu0 %v3297_v0 }
 0x7ae   :  { %2967 = vmatprep.subr.bf16.mxu0 %v3365_v14 }
 0x7b1   :  { %2969 = vmatpush1.bf16.msra.mxu0 %v3374_v18 }
 0x7b2   :  { %2971 = vmatprep.subr.bf16.mxu0 %v3377_v19 }
 0x7b5   :  { %2973 = vmatpush1.bf16.msra.mxu0 %v3385_v25 }
 0x7b6   :  { %2975 = vmatprep.subr.bf16.mxu0 %v3388_v26 }
 0x7b9   :  { %2977 = vmatpush1.bf16.msra.mxu0 %v3396_v30 }
 0x7ba   :  { %2997 = vmatprep.subr.bf16.mxu0 %v3361_v8 }
 0x81a   :  { %v908_v11 = vpop.permute.xlu1 %907 }
 0x81b   :  { %910 = vst.msk [vmem:[%s3866_s7 + $0x8] sm:$0xff] %vm466_vm4, %v908_v11  ;;  %2673 = vmatmul.mubr.msk.f32.vlgmr.msra.gmra.mrb[6].mxu1 %vm466_vm4, %v908_v11 }
 0x81c   :  { %2952 = vmatpush3.bf16.msra.mxu1 %v3453_v57  ;;  %2691 = vmatprep.mubr.msk.f32.mxu1 %vm3300_vm2, %v3297_v0 }
 0x81d   :  { %2953 = vmatprep.subr.bf16.mxu1 %v3299_v56 }
 0x820   :  { %2955 = vmatpush3.bf16.msra.mxu1 %v3460_v59 }
 0x821   :  { %2956 = vmatprep.subr.bf16.mxu1 %v3299_v56 }
 0x824   :  { %2958 = vmatpush3.bf16.msra.mxu1 %v3470_v62 }
 0x825   :  { %2959 = vmatprep.subr.bf16.mxu1 %v3299_v56 }
 0x828   :  { %2961 = vmatpush3.bf16.msra.mxu1 %v3480_v2 }
 0x829   :  { %2978 = vmatprep.subr.bf16.mxu1 %v3299_v56 }
 0x82b   :  { %2692 = vmatmul.mubr.msk.f32.vlgmr.msra.gmra.mrb[8].mxu1 %vm259_vm3, %v740_v10 }
 0x82c   :  { %2980 = vmatpush3.bf16.msra.mxu1 %v3497_v17  ;;  %2702 = vmatprep.mubr.msk.f32.mxu1 %vm3300_vm2, %v3297_v0 }
 0x82d   :  { %2981 = vmatprep.subr.bf16.mxu1 %v3299_v56 }
 0x830   :  { %2983 = vmatpush3.bf16.msra.mxu1 %v3508_v23 }
 0x831   :  { %2984 = vmatprep.subr.bf16.mxu1 %v3299_v56 }
 0x87f   :  { %v982_v5 = vpop.f32.mrb[6].mxu0 }
 0x880   :  { %v984_v12 = vpop.f32.mrb[7].mxu0  ;;  %v3122_v29 = vadd.f32 %v982_v5, %v3439_v45 }
 0x881   :  { %v3123_v24 = vadd.f32 %v984_v12, %v3435_v39 }
 0x882   :  { %v989_v33 = vmul.f32 0.5, %v3122_v29 }
 0x883   :  { %v990_v60 = vmul.f32 0.5, %v3123_v24 }
 0x8ee   :  { %v1083_v13 = vpop.f32.mrb[6].mxu1 }
 0x8ef   :  { %v2674_v15 = vpop.f32.mrb[7].mxu1 }
 0x8fe   :  { %v1153_v16 = vpop.f32.mrb[8].mxu1 }
 0x8ff   :  { %v1154_v20 = vadd.f32 %v1153_v16, %v1083_v13  ;;  %v2693_v21 = vpop.f32.mrb[9].mxu1 }
 0x901   :  { %v1157_v22 = vadd.f32 %v3534_v31, %v1154_v20 }
 0x903   :  { %3193 = vtanh.f32 %v1157_v22  ;;  %v1158_v32 = vmul.f32 0.5, %v1157_v22 }
 0x904   :  { %3195 = vtanh.f32 %v3123_v24 }
 0x905   :  { %3197 = vtanh.f32 %v1158_v32 }
 0x906   :  { %3199 = vtanh.f32 %v989_v33 }
 0x90d   :  { %v3194_v27 = vpop.eup %3193 }
 0x90e   :  { %1165 = vrot.lane.b32.xlu1 %v3194_v27, %s3301_s0  ;;  %v3196_v28 = vpop.eup %3195 }
 0x90f   :  { %v3198_v34 = vpop.eup %3197 }
 0x910   :  { %v1160_v35 = vmul.f32 0.5, %v3198_v34  ;;  %v3200_v36 = vpop.eup %3199 }
 0x911   :  { %v993_v38 = vmul.f32 0.5, %v3200_v36 }
 0x912   :  { %1000 = vrot.lane.b32.xlu1 %v3196_v28, %s3298_s9  ;;  %v1161_v37 = vadd.f32 0.5, %v1160_v35 }
 0x913   :  { %v995_v42 = vadd.f32 0.5, %v993_v38 }
 0x914   :  { %v1163_v46 = vmul.f32 %v1161_v37, %v3593_v52 }
 0x915   :  { %v998_v49 = vmul.f32 %v995_v42, %v3597_v55 }
 0x980   :  { %v1166_v40 = vpop.permute.xlu1 %1165 }
 0x981   :  { %v1168_v41 = vmul.f32 %v1166_v40, %v1161_v37 }
 0x983   :  { %1170 = vrot.lane.b32.xlu0 %v1168_v41, %s3301_s0 }
 0x984   :  { %v1001_v43 = vpop.permute.xlu1 %1000 }
 0x985   :  { %v1003_v44 = vmul.f32 %v1001_v43, %v995_v42 }
 0x987   :  { %1005 = vrot.lane.b32.xlu1 %v1003_v44, %s3298_s9 }
 0x9f5   :  { %v1171_v47 = vpop.permute.xlu0 %1170 }
 0x9f6   :  { %v3643_v48 = vadd.f32 %v1171_v47, %v1163_v46 }
 0x9f8   :  { %3201 = vtanh.f32 %v3643_v48 }
 0x9f9   :  { %v1006_v50 = vpop.permute.xlu1 %1005 }
 0x9fa   :  { %v3647_v51 = vadd.f32 %v1006_v50, %v998_v49 }
 0x9fc   :  { %3203 = vtanh.f32 %v3647_v51 }
 0x9fd   :  { %3205 = vtanh.f32 %v990_v60 }
 0xa02   :  { %v3202_v53 = vpop.eup %3201 }
 0xa03   :  { %1176 = vrot.lane.b32.xlu0 %v3202_v53, %s3301_s0 }
 0xa06   :  { %v3204_v54 = vpop.eup %3203 }
 0xa07   :  { %1011 = vrot.lane.b32.xlu1 %v3204_v54, %s3298_s9  ;;  %v3206_v52 = vpop.eup %3205 }
 0xa08   :  { %v994_v61 = vmul.f32 0.5, %v3206_v52 }
 0xa0a   :  { %v996_v55 = vadd.f32 0.5, %v994_v61 }
 0xa75   :  { %v1177_v1 = vpop.permute.xlu0 %1176 }
 0xa76   :  { %v1179_v58 = vmul.f32 %v1177_v1, %v1161_v37 }
 0xa78   :  { %1181 = vrot.lane.b32.xlu0 %v1179_v58, %s3298_s9 }
 0xa79   :  { %v1012_v3 = vpop.permute.xlu1 %1011 }
 0xa7a   :  { %v1014_v4 = vmul.f32 %v1012_v3, %v996_v55 }
 0xa7c   :  { %2478 = vmatmul.mubr.msk.f32.vlgmr.msra.gmra.mrb[8].mxu0 %vm259_vm3, %v1014_v4 }
 0xa7d   :  { %2999 = vmatpush1.bf16.msra.mxu0 %v3363_v9  ;;  %1528 = vmatprep.mubr.f32.mxu0 %v3297_v0 }
 0xa7e   :  { %3001 = vmatprep.subr.bf16.mxu0 %v3365_v14 }
 0xa81   :  { %3003 = vmatpush1.bf16.msra.mxu0 %v3374_v18 }
 0xa82   :  { %3005 = vmatprep.subr.bf16.mxu0 %v3377_v19 }
 0xa85   :  { %3007 = vmatpush1.bf16.msra.mxu0 %v3385_v25 }
 0xa86   :  { %3009 = vmatprep.subr.bf16.mxu0 %v3388_v26 }
 0xa89   :  { %3011 = vmatpush1.bf16.msra.mxu0 %v3396_v30 }
 0xa8a   :  { %3031 = vmatprep.subr.bf16.mxu0 %v3361_v8 }
 0xaea   :  { %v1182_v6 = vpop.permute.xlu0 %1181 }
 0xaeb   :  { %1184 = vst.msk [vmem:[%s3866_s7 + $0x10] sm:$0xff] %vm466_vm4, %v1182_v6  ;;  %2703 = vmatmul.mubr.msk.f32.vlgmr.msra.gmra.mrb[10].mxu1 %vm466_vm4, %v1182_v6 }
 0xaec   :  { %2986 = vmatpush3.bf16.msra.mxu1 %v3453_v57  ;;  %2721 = vmatprep.mubr.msk.f32.mxu1 %vm3300_vm2, %v3297_v0 }
 0xaed   :  { %2987 = vmatprep.subr.bf16.mxu1 %v3299_v56 }
 0xaf0   :  { %2989 = vmatpush3.bf16.msra.mxu1 %v3460_v59 }
 0xaf1   :  { %2990 = vmatprep.subr.bf16.mxu1 %v3299_v56 }
 0xaf4   :  { %2992 = vmatpush3.bf16.msra.mxu1 %v3470_v62 }
 0xaf5   :  { %2993 = vmatprep.subr.bf16.mxu1 %v3299_v56 }
 0xaf8   :  { %2995 = vmatpush3.bf16.msra.mxu1 %v3480_v2 }
 0xaf9   :  { %3012 = vmatprep.subr.bf16.mxu1 %v3299_v56 }
 0xafb   :  { %2722 = vmatmul.mubr.msk.f32.vlgmr.msra.gmra.mrb[12].mxu1 %vm259_vm3, %v1014_v4 }
 0xafc   :  { %3014 = vmatpush3.bf16.msra.mxu1 %v3497_v17  ;;  %2732 = vmatprep.mubr.msk.f32.mxu1 %vm3300_vm2, %v3297_v0 }
 0xafd   :  { %3015 = vmatprep.subr.bf16.mxu1 %v3299_v56 }
 0xb00   :  { %3017 = vmatpush3.bf16.msra.mxu1 %v3508_v23 }
 0xb01   :  { %3018 = vmatprep.subr.bf16.mxu1 %v3299_v56 }
 0xb4f   :  { %v1256_v63 = vpop.f32.mrb[8].mxu0 }
 0xb50   :  { %v1258_v7 = vpop.f32.mrb[9].mxu0  ;;  %v3124_v22 = vadd.f32 %v1256_v63, %v3439_v45 }
 0xb51   :  { %v3125_v16 = vadd.f32 %v1258_v7, %v3435_v39 }
 0xb52   :  { %v1263_v27 = vmul.f32 0.5, %v3124_v22 }
 0xb53   :  { %v1264_v53 = vmul.f32 0.5, %v3125_v16 }
 0xbbe   :  { %v1357_v10 = vpop.f32.mrb[10].mxu1 }
 0xbbf   :  { %v2704_v11 = vpop.f32.mrb[11].mxu1 }
 0xbce   :  { %v1427_v5 = vpop.f32.mrb[12].mxu1 }
 0xbcf   :  { %v1428_v12 = vadd.f32 %v1427_v5, %v1357_v10  ;;  %v2723_v13 = vpop.f32.mrb[13].mxu1 }
 0xbd1   :  { %v1431_v15 = vadd.f32 %v3534_v31, %v1428_v12 }
 0xbd3   :  { %3207 = vtanh.f32 %v1431_v15  ;;  %v1432_v24 = vmul.f32 0.5, %v1431_v15 }
 0xbd4   :  { %3209 = vtanh.f32 %v3125_v16 }
 0xbd5   :  { %3211 = vtanh.f32 %v1432_v24 }
 0xbd6   :  { %3213 = vtanh.f32 %v1263_v27 }
 0xbdd   :  { %v3208_v20 = vpop.eup %3207 }
 0xbde   :  { %1439 = vrot.lane.b32.xlu0 %v3208_v20, %s3301_s0  ;;  %v3210_v21 = vpop.eup %3209 }
 0xbdf   :  { %v3212_v28 = vpop.eup %3211 }
 0xbe0   :  { %v1434_v29 = vmul.f32 0.5, %v3212_v28  ;;  %v3214_v32 = vpop.eup %3213 }
 0xbe1   :  { %v1267_v34 = vmul.f32 0.5, %v3214_v32 }
 0xbe2   :  { %1274 = vrot.lane.b32.xlu0 %v3210_v21, %s3298_s9  ;;  %v1435_v33 = vadd.f32 0.5, %v1434_v29 }
 0xbe3   :  { %v1269_v37 = vadd.f32 0.5, %v1267_v34 }
 0xbe4   :  { %v1437_v41 = vmul.f32 %v1435_v33, %v3643_v48 }
 0xbe5   :  { %v1272_v44 = vmul.f32 %v1269_v37, %v3647_v51 }
 0xc50   :  { %v1440_v35 = vpop.permute.xlu0 %1439 }
 0xc51   :  { %v1442_v36 = vmul.f32 %v1440_v35, %v1435_v33 }
 0xc53   :  { %1444 = vrot.lane.b32.xlu1 %v1442_v36, %s3301_s0 }
 0xc54   :  { %v1275_v38 = vpop.permute.xlu0 %1274 }
 0xc55   :  { %v1277_v40 = vmul.f32 %v1275_v38, %v1269_v37 }
 0xc57   :  { %1279 = vrot.lane.b32.xlu0 %v1277_v40, %s3298_s9 }
 0xcc5   :  { %v1445_v42 = vpop.permute.xlu1 %1444 }
 0xcc6   :  { %v3693_v43 = vadd.f32 %v1445_v42, %v1437_v41 }
 0xcc8   :  { %3215 = vtanh.f32 %v3693_v43 }
 0xcc9   :  { %v1280_v46 = vpop.permute.xlu0 %1279 }
 0xcca   :  { %v3697_v47 = vadd.f32 %v1280_v46, %v1272_v44 }
 0xccc   :  { %3217 = vtanh.f32 %v3697_v47 }
 0xccd   :  { %3219 = vtanh.f32 %v1264_v53 }
 0xcd2   :  { %v3216_v49 = vpop.eup %3215 }
 0xcd3   :  { %1450 = vrot.lane.b32.xlu1 %v3216_v49, %s3301_s0 }
 0xcd6   :  { %v3218_v50 = vpop.eup %3217 }
 0xcd7   :  { %1285 = vrot.lane.b32.xlu0 %v3218_v50, %s3298_s9  ;;  %v3220_v48 = vpop.eup %3219 }
 0xcd8   :  { %v1268_v54 = vmul.f32 0.5, %v3220_v48 }
 0xcda   :  { %v1270_v51 = vadd.f32 0.5, %v1268_v54 }
 0xd45   :  { %v1451_v60 = vpop.permute.xlu1 %1450 }
 0xd46   :  { %v1453_v52 = vmul.f32 %v1451_v60, %v1435_v33 }
 0xd48   :  { %1455 = vrot.lane.b32.xlu1 %v1453_v52, %s3298_s9 }
 0xd49   :  { %v1286_v61 = vpop.permute.xlu0 %1285 }
 0xd4a   :  { %v1288_v1 = vmul.f32 %v1286_v61, %v1270_v51 }
 0xd4c   :  { %2481 = vmatmul.mubr.msk.f32.vlgmr.msra.gmra.mrb[10].mxu0 %vm259_vm3, %v1288_v1 }
 0xd4d   :  { %3033 = vmatpush1.bf16.msra.mxu0 %v3363_v9  ;;  %1802 = vmatprep.mubr.f32.mxu0 %v3297_v0 }
 0xd4e   :  { %3035 = vmatprep.subr.bf16.mxu0 %v3365_v14 }
 0xd51   :  { %3037 = vmatpush1.bf16.msra.mxu0 %v3374_v18 }
 0xd52   :  { %3039 = vmatprep.subr.bf16.mxu0 %v3377_v19 }
 0xd55   :  { %3041 = vmatpush1.bf16.msra.mxu0 %v3385_v25 }
 0xd56   :  { %3043 = vmatprep.subr.bf16.mxu0 %v3388_v26 }
 0xd59   :  { %3045 = vmatpush1.bf16.msra.mxu0 %v3396_v30 }
 0xd5a   :  { %3065 = vmatprep.subr.bf16.mxu0 %v3361_v8 }
 0xdba   :  { %v1456_v58 = vpop.permute.xlu1 %1455 }
 0xdbb   :  { %1458 = vst.msk [vmem:[%s3866_s7 + $0x18] sm:$0xff] %vm466_vm4, %v1456_v58  ;;  %2733 = vmatmul.mubr.msk.f32.vlgmr.msra.gmra.mrb[14].mxu1 %vm466_vm4, %v1456_v58 }
 0xdbc   :  { %3020 = vmatpush3.bf16.msra.mxu1 %v3453_v57  ;;  %2751 = vmatprep.mubr.msk.f32.mxu1 %vm3300_vm2, %v3297_v0 }
 0xdbd   :  { %3021 = vmatprep.subr.bf16.mxu1 %v3299_v56 }
 0xdc0   :  { %3023 = vmatpush3.bf16.msra.mxu1 %v3460_v59 }
 0xdc1   :  { %3024 = vmatprep.subr.bf16.mxu1 %v3299_v56 }
 0xdc4   :  { %3026 = vmatpush3.bf16.msra.mxu1 %v3470_v62 }
 0xdc5   :  { %3027 = vmatprep.subr.bf16.mxu1 %v3299_v56 }
 0xdc8   :  { %3029 = vmatpush3.bf16.msra.mxu1 %v3480_v2 }
 0xdc9   :  { %3046 = vmatprep.subr.bf16.mxu1 %v3299_v56 }
 0xdcb   :  { %2752 = vmatmul.mubr.msk.f32.vlgmr.msra.gmra.mrb[16].mxu1 %vm259_vm3, %v1288_v1 }
 0xdcc   :  { %3048 = vmatpush3.bf16.msra.mxu1 %v3497_v17  ;;  %2762 = vmatprep.mubr.msk.f32.mxu1 %vm3300_vm2, %v3297_v0 }
 0xdcd   :  { %3049 = vmatprep.subr.bf16.mxu1 %v3299_v56 }
 0xdd0   :  { %3051 = vmatpush3.bf16.msra.mxu1 %v3508_v23 }
 0xdd1   :  { %3052 = vmatprep.subr.bf16.mxu1 %v3299_v56 }
 0xe1f   :  { %v1530_v8 = vpop.f32.mrb[10].mxu0 }
 0xe20   :  { %v1532_v55 = vpop.f32.mrb[11].mxu0  ;;  %v3126_v13 = vadd.f32 %v1530_v8, %v3439_v45 }
 0xe21   :  { %v3127_v11 = vadd.f32 %v1532_v55, %v3435_v39 }
 0xe22   :  { %v1537_v16 = vmul.f32 0.5, %v3126_v13 }
 0xe23   :  { %v1538_v46 = vmul.f32 0.5, %v3127_v11 }
 0xe8e   :  { %v1631_v3 = vpop.f32.mrb[14].mxu1 }
 0xe8f   :  { %v2734_v4 = vpop.f32.mrb[15].mxu1 }
 0xe9e   :  { %v1701_v6 = vpop.f32.mrb[16].mxu1 }
 0xe9f   :  { %v1702_v63 = vadd.f32 %v1701_v6, %v1631_v3  ;;  %v2753_v7 = vpop.f32.mrb[17].mxu1 }
 0xea1   :  { %v1705_v10 = vadd.f32 %v3534_v31, %v1702_v63 }
 0xea3   :  { %3221 = vtanh.f32 %v1705_v10  ;;  %v1706_v15 = vmul.f32 0.5, %v1705_v10 }
 0xea4   :  { %3223 = vtanh.f32 %v3127_v11 }
 0xea5   :  { %3225 = vtanh.f32 %v1706_v15 }
 0xea6   :  { %3227 = vtanh.f32 %v1537_v16 }
 0xead   :  { %v3222_v5 = vpop.eup %3221 }
 0xeae   :  { %1713 = vrot.lane.b32.xlu1 %v3222_v5, %s3301_s0  ;;  %v3224_v12 = vpop.eup %3223 }
 0xeaf   :  { %v3226_v20 = vpop.eup %3225 }
 0xeb0   :  { %v1708_v21 = vmul.f32 0.5, %v3226_v20  ;;  %v3228_v22 = vpop.eup %3227 }
 0xeb1   :  { %v1541_v27 = vmul.f32 0.5, %v3228_v22 }
 0xeb2   :  { %1548 = vrot.lane.b32.xlu1 %v3224_v12, %s3298_s9  ;;  %v1709_v24 = vadd.f32 0.5, %v1708_v21 }
 0xeb3   :  { %v1543_v32 = vadd.f32 0.5, %v1541_v27 }
 0xeb4   :  { %v1711_v35 = vmul.f32 %v1709_v24, %v3693_v43 }
 0xeb5   :  { %v1546_v38 = vmul.f32 %v1543_v32, %v3697_v47 }
 0xf20   :  { %v1714_v28 = vpop.permute.xlu1 %1713 }
 0xf21   :  { %v1716_v29 = vmul.f32 %v1714_v28, %v1709_v24 }
 0xf23   :  { %1718 = vrot.lane.b32.xlu0 %v1716_v29, %s3301_s0 }
 0xf24   :  { %v1549_v33 = vpop.permute.xlu1 %1548 }
 0xf25   :  { %v1551_v34 = vmul.f32 %v1549_v33, %v1543_v32 }
 0xf27   :  { %1553 = vrot.lane.b32.xlu1 %v1551_v34, %s3298_s9 }
 0xf95   :  { %v1719_v36 = vpop.permute.xlu0 %1718 }
 0xf96   :  { %v3743_v37 = vadd.f32 %v1719_v36, %v1711_v35 }
 0xf98   :  { %3229 = vtanh.f32 %v3743_v37 }
 0xf99   :  { %v1554_v40 = vpop.permute.xlu1 %1553 }
 0xf9a   :  { %v3747_v41 = vadd.f32 %v1554_v40, %v1546_v38 }
 0xf9c   :  { %3231 = vtanh.f32 %v3747_v41 }
 0xf9d   :  { %3233 = vtanh.f32 %v1538_v46 }
 0xfa2   :  { %v3230_v42 = vpop.eup %3229 }
 0xfa3   :  { %1724 = vrot.lane.b32.xlu0 %v3230_v42, %s3301_s0 }
 0xfa6   :  { %v3232_v44 = vpop.eup %3231 }
 0xfa7   :  { %1559 = vrot.lane.b32.xlu1 %v3232_v44, %s3298_s9  ;;  %v3234_v43 = vpop.eup %3233 }
 0xfa8   :  { %v1542_v49 = vmul.f32 0.5, %v3234_v43 }
 0xfaa   :  { %v1544_v47 = vadd.f32 0.5, %v1542_v49 }
0x1015   :  { %v1725_v50 = vpop.permute.xlu0 %1724 }
0x1016   :  { %v1727_v53 = vmul.f32 %v1725_v50, %v1709_v24 }
0x1018   :  { %1729 = vrot.lane.b32.xlu0 %v1727_v53, %s3298_s9 }
0x1019   :  { %v1560_v48 = vpop.permute.xlu1 %1559 }
0x101a   :  { %v1562_v54 = vmul.f32 %v1560_v48, %v1544_v47 }
0x101c   :  { %2484 = vmatmul.mubr.msk.f32.vlgmr.msra.gmra.mrb[12].mxu0 %vm259_vm3, %v1562_v54 }
0x101d   :  { %3067 = vmatpush1.bf16.msra.mxu0 %v3363_v9  ;;  %2076 = vmatprep.mubr.f32.mxu0 %v3297_v0 }
0x101e   :  { %3069 = vmatprep.subr.bf16.mxu0 %v3365_v14 }
0x1021   :  { %3071 = vmatpush1.bf16.msra.mxu0 %v3374_v18 }
0x1022   :  { %3073 = vmatprep.subr.bf16.mxu0 %v3377_v19 }
0x1025   :  { %3075 = vmatpush1.bf16.msra.mxu0 %v3385_v25 }
0x1026   :  { %3077 = vmatprep.subr.bf16.mxu0 %v3388_v26 }
0x1029   :  { %3079 = vmatpush1.bf16.msra.mxu0 %v3396_v30 }
0x102a   :  { %3086 = vmatprep.subr.bf16.mxu0 %v3299_v56 }
0x108a   :  { %v1730_v60 = vpop.permute.xlu0 %1729 }
0x108b   :  { %1732 = vst.msk [vmem:[%s3866_s7 + $0x20] sm:$0xff] %vm466_vm4, %v1730_v60  ;;  %2763 = vmatmul.mubr.msk.f32.vlgmr.msra.gmra.mrb[18].mxu1 %vm466_vm4, %v1730_v60 }
0x108c   :  { %3054 = vmatpush3.bf16.msra.mxu1 %v3453_v57  ;;  %2781 = vmatprep.mubr.msk.f32.mxu1 %vm3300_vm2, %v3297_v0 }
0x108d   :  { %3055 = vmatprep.subr.bf16.mxu1 %v3299_v56 }
0x1090   :  { %3057 = vmatpush3.bf16.msra.mxu1 %v3460_v59 }
0x1091   :  { %3058 = vmatprep.subr.bf16.mxu1 %v3299_v56 }
0x1094   :  { %3060 = vmatpush3.bf16.msra.mxu1 %v3470_v62 }
0x1095   :  { %3061 = vmatprep.subr.bf16.mxu1 %v3299_v56 }
0x1098   :  { %3063 = vmatpush3.bf16.msra.mxu1 %v3480_v2 }
0x1099   :  { %3080 = vmatprep.subr.bf16.mxu1 %v3299_v56 }
0x109b   :  { %2782 = vmatmul.mubr.msk.f32.vlgmr.msra.gmra.mrb[20].mxu1 %vm259_vm3, %v1562_v54 }
0x109c   :  { %3082 = vmatpush3.bf16.msra.mxu1 %v3497_v17  ;;  %2792 = vmatprep.mubr.msk.f32.mxu1 %vm3300_vm2, %v3297_v0 }
0x109d   :  { %3083 = vmatprep.subr.bf16.mxu1 %v3299_v56 }
0x10a0   :  { %3085 = vmatpush3.bf16.msra.mxu1 %v3508_v23 }
0x10a1   :  { %3098 = vmatprep.subr.bf16.mxu1 %v3299_v56 }
0x10ef   :  { %v1804_v9 = vpop.f32.mrb[12].mxu0 }
0x10f0   :  { %v1806_v14 = vpop.f32.mrb[13].mxu0  ;;  %v3128_v25 = vadd.f32 %v1804_v9, %v3439_v45 }
0x10f1   :  { %v3129_v18 = vadd.f32 %v1806_v14, %v3435_v39 }
0x10f2   :  { %v1811_v26 = vmul.f32 0.5, %v3128_v25 }
0x10f3   :  { %3235 = vtanh.f32 %v3129_v18  ;;  %v1812_v22 = vmul.f32 0.5, %v3129_v18 }
0x10f4   :  { %3237 = vtanh.f32 %v1811_v26 }
0x10fd   :  { %v3236_v19 = vpop.eup %3235 }
0x10fe   :  { %1822 = vrot.lane.b32.xlu1 %v3236_v19, %s3298_s9  ;;  %v3238_v51 = vpop.eup %3237 }
0x10ff   :  { %v1815_v61 = vmul.f32 0.5, %v3238_v51 }
0x1101   :  { %v1817_v55 = vadd.f32 0.5, %v1815_v61 }
0x1103   :  { %v1820_v10 = vmul.f32 %v1817_v55, %v3747_v41 }
0x115e   :  { %v1905_v30 = vpop.f32.mrb[18].mxu1 }
0x115f   :  { %v2764_v52 = vpop.f32.mrb[19].mxu1 }
0x116e   :  { %v1975_v1 = vpop.f32.mrb[20].mxu1 }
0x116f   :  { %v1976_v58 = vadd.f32 %v1975_v1, %v1905_v30  ;;  %v2783_v8 = vpop.f32.mrb[21].mxu1 }
0x1170   :  { %v1823_v3 = vpop.permute.xlu1 %1822 }
0x1171   :  { %v1979_v4 = vadd.f32 %v3534_v31, %v1976_v58  ;;  %v1825_v6 = vmul.f32 %v1823_v3, %v1817_v55 }
0x1173   :  { %3239 = vtanh.f32 %v1979_v4  ;;  %1827 = vrot.lane.b32.xlu1 %v1825_v6, %s3298_s9  ;;  %v1980_v7 = vmul.f32 0.5, %v1979_v4 }
0x1175   :  { %3241 = vtanh.f32 %v1980_v7 }
0x117d   :  { %v3240_v63 = vpop.eup %3239 }
0x117e   :  { %1987 = vrot.lane.b32.xlu0 %v3240_v63, %s3301_s0 }
0x117f   :  { %v3242_v12 = vpop.eup %3241 }
0x1180   :  { %v1982_v13 = vmul.f32 0.5, %v3242_v12 }
0x1182   :  { %v1983_v15 = vadd.f32 0.5, %v1982_v13 }
0x1184   :  { %v1985_v28 = vmul.f32 %v1983_v15, %v3743_v37 }
0x11e5   :  { %v1828_v11 = vpop.permute.xlu1 %1827 }
0x11e6   :  { %v3792_v5 = vadd.f32 %v1828_v11, %v1820_v10 }
0x11e8   :  { %3243 = vtanh.f32 %v3792_v5 }
0x11e9   :  { %3245 = vtanh.f32 %v1812_v22 }
0x11f0   :  { %v1988_v16 = vpop.permute.xlu0 %1987 }
0x11f1   :  { %v1990_v20 = vmul.f32 %v1988_v16, %v1983_v15 }
0x11f2   :  { %v3244_v21 = vpop.eup %3243 }
0x11f3   :  { %1992 = vrot.lane.b32.xlu0 %v1990_v20, %s3301_s0  ;;  %1833 = vrot.lane.b32.xlu1 %v3244_v21, %s3298_s9  ;;  %v3246_v24 = vpop.eup %3245 }
0x11f4   :  { %v1816_v27 = vmul.f32 0.5, %v3246_v24 }
0x11f6   :  { %v1818_v29 = vadd.f32 0.5, %v1816_v27 }
0x1265   :  { %v1993_v32 = vpop.permute.xlu0 %1992  ;;  %v1834_v33 = vpop.permute.xlu1 %1833 }
0x1266   :  { %v1995_v34 = vadd.f32 %v1993_v32, %v1985_v28  ;;  %v1836_v35 = vmul.f32 %v1834_v33, %v1818_v29 }
0x1268   :  { %3247 = vtanh.f32 %v1995_v34  ;;  %2487 = vmatmul.mubr.msk.f32.vlgmr.msra.gmra.mrb[14].mxu0 %vm259_vm3, %v1836_v35 }
0x1269   :  { %3088 = vmatpush3.bf16.msra.mxu0 %v3453_v57  ;;  %2811 = vmatprep.mubr.msk.f32.mxu0 %vm3300_vm2, %v3297_v0 }
0x126a   :  { %3089 = vmatprep.subr.bf16.mxu0 %v3299_v56 }
0x126d   :  { %3091 = vmatpush3.bf16.msra.mxu0 %v3460_v59 }
0x126e   :  { %3092 = vmatprep.subr.bf16.mxu0 %v3299_v56 }
0x1271   :  { %3094 = vmatpush3.bf16.msra.mxu0 %v3470_v62 }
0x1272   :  { %v3248_v36 = vpop.eup %3247  ;;  %3095 = vmatprep.subr.bf16.mxu0 %v3299_v56 }
0x1273   :  { %1998 = vrot.lane.b32.xlu0 %v3248_v36, %s3301_s0 }
0x1275   :  { %3097 = vmatpush3.bf16.msra.mxu0 %v3480_v2 }
0x1278   :  { %2812 = vmatmul.mubr.msk.f32.vlgmr.msra.gmra.mrb[18].mxu0 %vm259_vm3, %v1836_v35 }
0x12e5   :  { %v1999_v37 = vpop.permute.xlu0 %1998 }
0x12e6   :  { %v2001_v38 = vmul.f32 %v1999_v37, %v1983_v15 }
0x12e8   :  { %2003 = vrot.lane.b32.xlu0 %v2001_v38, %s3298_s9 }
0x133b   :  { %v2078_v40 = vpop.f32.mrb[14].mxu0 }
0x133c   :  { %v2080_v41 = vpop.f32.mrb[15].mxu0  ;;  %v3130_v54 = vadd.f32 %v2078_v40, %v3439_v45 }
0x133d   :  { %v3131_v47 = vadd.f32 %v2080_v41, %v3435_v39 }
0x133e   :  { %v2085_v60 = vmul.f32 0.5, %v3130_v54 }
0x133f   :  { %v2086_v63 = vmul.f32 0.5, %v3131_v47 }
0x134b   :  { %v2249_v42 = vpop.f32.mrb[18].mxu0 }
0x134c   :  { %v2813_v44 = vpop.f32.mrb[19].mxu0 }
0x135a   :  { %v2004_v46 = vpop.permute.xlu0 %2003 }
0x135b   :  { %2006 = vst.msk [vmem:[%s3866_s7 + $0x28] sm:$0xff] %vm466_vm4, %v2004_v46  ;;  %2793 = vmatmul.mubr.msk.f32.vlgmr.msra.gmra.mrb[22].mxu1 %vm466_vm4, %v2004_v46 }
0x135c   :  { %3100 = vmatpush3.bf16.msra.mxu1 %v3497_v17  ;;  %2822 = vmatprep.mubr.msk.f32.mxu1 %vm3300_vm2, %v3297_v0 }
0x135d   :  { %3101 = vmatprep.subr.bf16.mxu1 %v3299_v56 }
0x1360   :  { %3103 = vmatpush3.bf16.msra.mxu1 %v3508_v23 }
0x1361   :  { %3104 = vmatprep.subr.bf16.mxu1 %v3299_v56 }
0x142e   :  { %v2179_v43 = vpop.f32.mrb[22].mxu1 }
0x142f   :  { %v2250_v49 = vadd.f32 %v2249_v42, %v2179_v43  ;;  %v2794_v50 = vpop.f32.mrb[23].mxu1 }
0x1431   :  { %v2253_v53 = vadd.f32 %v3534_v31, %v2250_v49 }
0x1433   :  { %3249 = vtanh.f32 %v2253_v53  ;;  %v2254_v23 = vmul.f32 0.5, %v2253_v53 }
0x1434   :  { %3251 = vtanh.f32 %v3131_v47 }
0x1435   :  { %3253 = vtanh.f32 %v2254_v23 }
0x1436   :  { %3255 = vtanh.f32 %v2085_v60 }
0x143d   :  { %v3250_v48 = vpop.eup %3249 }
0x143e   :  { %2261 = vrot.lane.b32.xlu1 %v3250_v48, %s3301_s0  ;;  %v3252_v17 = vpop.eup %3251 }
0x143f   :  { %v3254_v9 = vpop.eup %3253 }
0x1440   :  { %v2256_v14 = vmul.f32 0.5, %v3254_v9  ;;  %v3256_v18 = vpop.eup %3255 }
0x1441   :  { %v2089_v19 = vmul.f32 0.5, %v3256_v18 }
0x1442   :  { %2096 = vrot.lane.b32.xlu1 %v3252_v17, %s3298_s9  ;;  %v2257_v31 = vadd.f32 0.5, %v2256_v14 }
0x1443   :  { %v2091_v26 = vadd.f32 0.5, %v2089_v19 }
0x1444   :  { %v2259_v51 = vmul.f32 %v2257_v31, %v1995_v34 }
0x1445   :  { %v2094_v1 = vmul.f32 %v2091_v26, %v3792_v5 }
0x14b0   :  { %v2262_v39 = vpop.permute.xlu1 %2261 }
0x14b1   :  { %v2264_v25 = vmul.f32 %v2262_v39, %v2257_v31 }
0x14b3   :  { %2266 = vrot.lane.b32.xlu0 %v2264_v25, %s3301_s0 }
0x14b4   :  { %v2097_v30 = vpop.permute.xlu1 %2096 }
0x14b5   :  { %v2099_v52 = vmul.f32 %v2097_v30, %v2091_v26 }
0x14b7   :  { %2101 = vrot.lane.b32.xlu1 %v2099_v52, %s3298_s9 }
0x1525   :  { %v2267_v45 = vpop.permute.xlu0 %2266 }
0x1526   :  { %v2269_v61 = vadd.f32 %v2267_v45, %v2259_v51 }
0x1528   :  { %3257 = vtanh.f32 %v2269_v61 }
0x1529   :  { %v2102_v58 = vpop.permute.xlu1 %2101 }
0x152a   :  { %v2104_v8 = vadd.f32 %v2102_v58, %v2094_v1 }
0x152c   :  { %3259 = vtanh.f32 %v2104_v8 }
0x152d   :  { %3261 = vtanh.f32 %v2086_v63 }
0x1532   :  { %v3258_v55 = vpop.eup %3257 }
0x1533   :  { %2272 = vrot.lane.b32.xlu0 %v3258_v55, %s3301_s0 }
0x1536   :  { %v3260_v3 = vpop.eup %3259 }
0x1537   :  { %2107 = vrot.lane.b32.xlu1 %v3260_v3, %s3298_s9  ;;  %v3262_v10 = vpop.eup %3261 }
0x1538   :  { %v2090_v11 = vmul.f32 0.5, %v3262_v10 }
0x153a   :  { %v2092_v12 = vadd.f32 0.5, %v2090_v11 }
0x15a5   :  { %v2273_v4 = vpop.permute.xlu0 %2272 }
0x15a6   :  { %v2275_v6 = vmul.f32 %v2273_v4, %v2257_v31 }
0x15a8   :  { %2277 = vrot.lane.b32.xlu0 %v2275_v6, %s3298_s9 }
0x15a9   :  { %v2108_v5 = vpop.permute.xlu1 %2107 }
0x161a   :  { %v2278_v7 = vpop.permute.xlu0 %2277 }
0x161b   :  { %2280 = vst.msk [vmem:[%s3866_s7 + $0x30] sm:$0xff] %vm466_vm4, %v2278_v7  ;;  %2823 = vmatmul.mubr.msk.f32.vlgmr.msra.gmra.mrb[24].mxu1 %vm466_vm4, %v2278_v7 }
0x161c   :  { %3106 = vmatpush3.bf16.msra.mxu1 %v3453_v57  ;;  %2841 = vmatprep.mubr.msk.f32.mxu1 %vm3300_vm2, %v3297_v0  ;;  %v2110_v57 = vmul.f32 %v2108_v5, %v2092_v12 }
0x161d   :  { %3107 = vmatprep.subr.bf16.mxu1 %v3299_v56 }
0x1620   :  { %3109 = vmatpush3.bf16.msra.mxu1 %v3460_v59  ;;  %v3269_v59 = vld [vmem:[%s3865_s6] ss:$0 sm:$0xff] }
0x1621   :  { %3110 = vmatprep.subr.bf16.mxu1 %v3299_v56 }
0x1624   :  { %3112 = vmatpush3.bf16.msra.mxu1 %v3470_v62 }
0x1625   :  { %3113 = vmatprep.subr.bf16.mxu1 %v3299_v56 }
0x1628   :  { %3115 = vmatpush3.bf16.msra.mxu1 %v3480_v2 }
0x162b   :  { %2842 = vmatmul.mubr.msk.f32.vlgmr.msra.gmra.mrb[26].mxu1 %vm259_vm3, %v2110_v57 }
0x16ee   :  { %v2349_v0 = vpop.f32.mrb[24].mxu1 }
0x16ef   :  { %v2824_v13 = vpop.f32.mrb[25].mxu1 }
0x16fe   :  { %v2422_v15 = vpop.f32.mrb[26].mxu1 }
0x16ff   :  { %v2423_v16 = vadd.f32 %v2422_v15, %v2349_v0  ;;  %v2843_v20 = vpop.f32.mrb[27].mxu1 }
0x1701   :  { %v2426_v21 = vadd.f32 %v3269_v59, %v2423_v16 }
0x1703   :  { %3263 = vtanh.f32 %v2426_v21  ;;  %v2427_v56 = vmul.f32 0.5, %v2426_v21 }
0x1705   :  { %3265 = vtanh.f32 %v2427_v56 }
0x170d   :  { %v3264_v62 = vpop.eup %3263 }
0x170e   :  { %2434 = vrot.lane.b32.xlu0 %v3264_v62, %s3301_s0 }
0x170f   :  { %v3266_v2 = vpop.eup %3265 }
0x1710   :  { %v2429_v22 = vmul.f32 0.5, %v3266_v2 }
0x1712   :  { %v2430_v24 = vadd.f32 0.5, %v2429_v22 }
0x1714   :  { %v2432_v29 = vmul.f32 %v2430_v24, %v2269_v61 }
0x1780   :  { %v2435_v27 = vpop.permute.xlu0 %2434 }
0x1781   :  { %v2437_v28 = vmul.f32 %v2435_v27, %v2430_v24 }
0x1783   :  { %2439 = vrot.lane.b32.xlu1 %v2437_v28, %s3301_s0 }
0x17f5   :  { %v2440_v32 = vpop.permute.xlu1 %2439 }
0x17f6   :  { %v2442_v33 = vadd.f32 %v2440_v32, %v2432_v29 }
0x17f8   :  { %3267 = vtanh.f32 %v2442_v33 }
0x1802   :  { %v3268_v34 = vpop.eup %3267 }
0x1803   :  { %2445 = vrot.lane.b32.xlu0 %v3268_v34, %s3301_s0 }
0x1875   :  { %v2446_v35 = vpop.permute.xlu0 %2445 }
0x1876   :  { %v2448_v36 = vmul.f32 %v2446_v35, %v2430_v24 }
0x1878   :  { %2450 = vrot.lane.b32.xlu1 %v2448_v36, %s3298_s9 }
0x18ea   :  { %v2451_v37 = vpop.permute.xlu1 %2450 }
0x18eb   :  { %2453 = vst.msk [vmem:[%s3866_s7 + $0x38] sm:$0xff] %vm466_vm4, %v2451_v37 }
0x18ec   :  { %2458 = vsyncpa [#allocation4], 1 }

</bundles_post_ra>
